<compile_context>
chip_gen: v7x
topology: tpu7x:2x2x1
jax: 0.10.0
libtpu: 0.0.40
codegen_flags: <defaults>
</compile_context>

<pallas_src>
import functools

import jax
import jax.numpy as jnp
from jax.experimental import pallas as pl
from jax.experimental.pallas import tpu as pltpu


# ------------------------------ fused kernel --------------------------------


def shallow_cnn_kernel(x_ref, w1_ref, s1_ref, t1_ref, w2_ref, s2_ref, t2_ref,
                       w3_ref, b3_ref, w4_ref, b4_ref, o_ref, flat_ref, *,
                       batch, length, ks1, ks2, l2):
    # x_ref:   (C_in, batch*length + ks1 - 1)  batch folded into lanes, zero tail pad
    # w1_ref:  (ks1, C1, C_in)   w1_ref[k] = k-th tap, used as (C1, C_in) matmul LHS
    # s?/t?:   (C?, 1)           folded BN scale / shift (conv bias absorbed)
    # w2_ref:  (ks2, C2, C1)
    # w3_ref:  (F, H)  b3_ref: (1, H)  w4_ref: (H, 2)  b4_ref: (1, 2)
    # o_ref:   (batch, 2)
    # flat_ref: VMEM scratch (batch, F) holding the channel-major flatten.
    c1 = w1_ref.shape[1]
    c2 = w2_ref.shape[1]
    wid1 = batch * length              # conv1 output width in the folded layout
    wid2 = wid1 - (ks2 - 1)            # conv2 output width in the folded layout

    x = x_ref[...]                     # (C_in, wid1 + ks1 - 1)

    # ---- layer1: Conv1d + folded BN + ReLU (one MXU matmul per tap, whole batch) ----
    acc1 = jnp.zeros((c1, wid1), jnp.float32)
    for k in range(ks1):               # static, unrolled tap loop
        acc1 = acc1 + jnp.dot(w1_ref[k], x[:, k:k + wid1],
                              preferred_element_type=jnp.float32)
    h1 = jnp.maximum(acc1 * s1_ref[...] + t1_ref[...], 0.0)     # (C1, wid1)

    # ---- layer2: Conv1d + folded BN + ReLU ----
    acc2 = jnp.zeros((c2, wid2), jnp.float32)
    for k in range(ks2):
        acc2 = acc2 + jnp.dot(w2_ref[k], h1[:, k:k + wid2],
                              preferred_element_type=jnp.float32)
    h2 = jnp.maximum(acc2 * s2_ref[...] + t2_ref[...], 0.0)     # (C2, wid2)

    # ---- flatten: PyTorch x.view(B, -1) is channel-major per sample ----
    # valid conv2 outputs for sample b live at lanes [b*length, b*length + l2)
    for b in range(batch):
        for c in range(c2):
            flat_ref[pl.ds(b, 1), pl.ds(c * l2, l2)] = (
                h2[c:c + 1, b * length:b * length + l2])

    flat = flat_ref[...]               # (batch, F)

    # ---- MLP head: Linear -> ReLU -> Linear -> Sigmoid ----
    h3 = jnp.maximum(
        jnp.dot(flat, w3_ref[...], preferred_element_type=jnp.float32) + b3_ref[...],
        0.0)
    z4 = jnp.dot(h3, w4_ref[...], preferred_element_type=jnp.float32) + b4_ref[...]
    o_ref[...] = jax.nn.sigmoid(z4).astype(o_ref.dtype)


# ------------------------------ host wrapper ---------------------------------


def fold_bn(gamma, beta, mean, var, conv_bias, eps=1e-5):
    scale = gamma / jnp.sqrt(var + eps)
    shift = beta + scale * (conv_bias - mean)
    return scale[:, None], shift[:, None]


@jax.jit
def shallow_cnn_forward(x, params):
    p = params
    batch, c_in, length = x.shape
    c1, _, ks1 = p["w1"].shape
    c2, _, ks2 = p["w2"].shape
    l1 = length - (ks1 - 1)
    l2 = l1 - (ks2 - 1)
    feat = c2 * l2
    hidden = p["w3"].shape[0]

    # Parameter / input prep -- fused into this jit, not repeated per kernel step.
    s1, t1 = fold_bn(p["bn1_gamma"], p["bn1_beta"], p["bn1_mean"], p["bn1_var"], p["b1"])
    s2, t2 = fold_bn(p["bn2_gamma"], p["bn2_beta"], p["bn2_mean"], p["bn2_var"], p["b2"])
    w1t = jnp.transpose(p["w1"], (2, 0, 1))      # (ks1, C1, C_in)
    w2t = jnp.transpose(p["w2"], (2, 0, 1))      # (ks2, C2, C1)
    w3m = p["w3"].T                              # (F, H)
    w4m = p["w4"].T                              # (H, 2)
    b3r = p["b3"][None, :]                       # (1, H)
    b4r = p["b4"][None, :]                       # (1, 2)

    # Fold batch into lanes: (B, C_in, L) -> (C_in, B*L); zero-pad the tail so every
    # conv tap k inside the kernel is one contiguous lane slice.
    xf = jnp.transpose(x, (1, 0, 2)).reshape(c_in, batch * length)
    xf = jnp.pad(xf, ((0, 0), (0, ks1 - 1)))

    kernel = functools.partial(shallow_cnn_kernel, batch=batch, length=length,
                               ks1=ks1, ks2=ks2, l2=l2)
    vmem = pl.BlockSpec(memory_space=pltpu.MemorySpace.VMEM)

    flops = 2 * (batch * l1 * c1 * c_in * ks1 + batch * l2 * c2 * c1 * ks2
                 + batch * feat * hidden + batch * hidden * 2)
    bytes_accessed = 4 * (xf.size + w1t.size + w2t.size + w3m.size + w4m.size
                          + 2 * (c1 + c2) + hidden + 2 + batch * 2)

    return pl.pallas_call(
        kernel,
        out_shape=jax.ShapeDtypeStruct((batch, 2), jnp.float32),
        in_specs=[vmem] * 11,
        out_specs=vmem,
        scratch_shapes=[pltpu.VMEM((batch, feat), jnp.float32)],
        cost_estimate=pl.CostEstimate(flops=flops, transcendentals=2 * batch,
                                      bytes_accessed=bytes_accessed),
    )(xf, w1t, s1, t1, w2t, s2, t2, w3m, b3r, w4m, b4r)


# ------------------------------ reference (JAX) ------------------------------


def _conv1d_ref(x, w, bias):
    ks = w.shape[2]
    l_out = x.shape[2] - ks + 1
    patches = jnp.stack([x[:, :, k:k + l_out] for k in range(ks)], axis=-1)  # (B,Cin,Lout,K)
    return jnp.einsum("bclk,ock->bol", patches, w) + bias[None, :, None]


def shallow_cnn_ref(x, p, eps=1e-5):
    z1 = _conv1d_ref(x, p["w1"], p["b1"])
    z1 = p["bn1_gamma"][None, :, None] * (z1 - p["bn1_mean"][None, :, None]) / jnp.sqrt(
        p["bn1_var"][None, :, None] + eps) + p["bn1_beta"][None, :, None]
    z1 = jnp.maximum(z1, 0.0)
    z2 = _conv1d_ref(z1, p["w2"], p["b2"])
    z2 = p["bn2_gamma"][None, :, None] * (z2 - p["bn2_mean"][None, :, None]) / jnp.sqrt(
        p["bn2_var"][None, :, None] + eps) + p["bn2_beta"][None, :, None]
    z2 = jnp.maximum(z2, 0.0)
    zf = z2.reshape(z2.shape[0], -1)
    h = jnp.maximum(zf @ p["w3"].T + p["b3"], 0.0)
    return jax.nn.sigmoid(h @ p["w4"].T + p["b4"])


# ----------------------------------- main ------------------------------------

if __name__ == "__main__":
    # Small config consistent with the module (in_channels fixed at 28 by the module).
    ntimesteps, minibatch = 50, 2
    in_ch, conv1, ks1, conv2, ks2, nb_hidden = 28, 16, 5, 32, 5, 32
    s = ntimesteps - (ks1 - 1) - (ks2 - 1)           # flattened spatial length
    flat = conv2 * s

    key = jax.random.PRNGKey(0)
    ks = jax.random.split(key, 12)
    params = {
        "w1": 0.1 * jax.random.normal(ks[0], (conv1, in_ch, ks1), jnp.float32),
        "b1": 0.1 * jax.random.normal(ks[1], (conv1,), jnp.float32),
        "bn1_gamma": 1.0 + 0.1 * jax.random.normal(ks[2], (conv1,), jnp.float32),
        "bn1_beta": 0.1 * jax.random.normal(ks[3], (conv1,), jnp.float32),
        "bn1_mean": 0.05 * jax.random.normal(ks[4], (conv1,), jnp.float32),
        "bn1_var": 1.0 + 0.1 * jax.random.uniform(ks[4], (conv1,), jnp.float32),
        "w2": 0.1 * jax.random.normal(ks[5], (conv2, conv1, ks2), jnp.float32),
        "b2": 0.1 * jax.random.normal(ks[6], (conv2,), jnp.float32),
        "bn2_gamma": 1.0 + 0.1 * jax.random.normal(ks[7], (conv2,), jnp.float32),
        "bn2_beta": 0.1 * jax.random.normal(ks[8], (conv2,), jnp.float32),
        "bn2_mean": 0.05 * jax.random.normal(ks[9], (conv2,), jnp.float32),
        "bn2_var": 1.0 + 0.1 * jax.random.uniform(ks[9], (conv2,), jnp.float32),
        "w3": 0.05 * jax.random.normal(ks[10], (nb_hidden, flat), jnp.float32),
        "b3": 0.05 * jax.random.normal(ks[10], (nb_hidden,), jnp.float32),
        "w4": 0.1 * jax.random.normal(ks[11], (2, nb_hidden), jnp.float32),
        "b4": 0.1 * jax.random.normal(ks[11], (2,), jnp.float32),
    }

    x = jax.random.normal(jax.random.PRNGKey(42), (minibatch, in_ch, ntimesteps), jnp.float32)

    out = jax.block_until_ready(shallow_cnn_forward(x, params))
    ref = jax.block_until_ready(shallow_cnn_ref(x, params))

    assert out.shape == (minibatch, 2), out.shape
    assert jnp.allclose(out, ref, atol=1e-4, rtol=1e-4), (out, ref)
    print("KERNEL_OK")
</pallas_src>

<mosaic_0001>
module attributes {stable_mosaic.version = 11 : i64} {
  func.func @shallow_cnn_kernel(%arg0: memref<28x104xf32, #tpu.memory_space<vmem>>, %arg1: memref<5x16x28xf32, #tpu.memory_space<vmem>>, %arg2: memref<16x1xf32, #tpu.memory_space<vmem>>, %arg3: memref<16x1xf32, #tpu.memory_space<vmem>>, %arg4: memref<5x32x16xf32, #tpu.memory_space<vmem>>, %arg5: memref<32x1xf32, #tpu.memory_space<vmem>>, %arg6: memref<32x1xf32, #tpu.memory_space<vmem>>, %arg7: memref<1344x32xf32, #tpu.memory_space<vmem>>, %arg8: memref<1x32xf32, #tpu.memory_space<vmem>>, %arg9: memref<32x2xf32, #tpu.memory_space<vmem>>, %arg10: memref<1x2xf32, #tpu.memory_space<vmem>>, %arg11: memref<2x2xf32, #tpu.memory_space<vmem>>, %arg12: memref<2x1344xf32, #tpu.memory_space<vmem>>) attributes {dimension_semantics = [], scalar_prefetch = 0 : i64, scratch_operands = 1 : i64, tpu.core_type = #tpu.core_type<tc>} {
    %c0 = arith.constant 0 : index
    %c0_0 = arith.constant 0 : index
    %0 = vector.load %arg0[%c0, %c0_0] : memref<28x104xf32, #tpu.memory_space<vmem>>, vector<28x104xf32>
    %cst = arith.constant 0.000000e+00 : f32
    %1 = vector.broadcast %cst : f32 to vector<16x100xf32>
    %c0_1 = arith.constant 0 : index
    %c0_2 = arith.constant 0 : index
    %c0_3 = arith.constant 0 : index
    %2 = vector.load %arg1[%c0_1, %c0_2, %c0_3] : memref<5x16x28xf32, #tpu.memory_space<vmem>>, vector<1x16x28xf32>
    %3 = vector.shape_cast %2 : vector<1x16x28xf32> to vector<16x28xf32>
    %4 = vector.extract_strided_slice %0 {offsets = [0, 0], sizes = [28, 100], strides = [1, 1]} : vector<28x104xf32> to vector<28x100xf32>
    %cst_4 = arith.constant dense<0.000000e+00> : vector<16x100xf32>
    %5 = tpu.matmul %3, %4, %cst_4 {dimension_numbers = #tpu.dot_dimension_numbers<[1], [0], [0], [1], [0, 0, 1, 1], [], []>} : vector<16x28xf32>, vector<28x100xf32>, vector<16x100xf32> -> vector<16x100xf32>
    %6 = arith.addf %1, %5 : vector<16x100xf32>
    %c1 = arith.constant 1 : index
    %c0_5 = arith.constant 0 : index
    %c0_6 = arith.constant 0 : index
    %7 = vector.load %arg1[%c1, %c0_5, %c0_6] : memref<5x16x28xf32, #tpu.memory_space<vmem>>, vector<1x16x28xf32>
    %8 = vector.shape_cast %7 : vector<1x16x28xf32> to vector<16x28xf32>
    %9 = vector.extract_strided_slice %0 {offsets = [0, 1], sizes = [28, 100], strides = [1, 1]} : vector<28x104xf32> to vector<28x100xf32>
    %cst_7 = arith.constant dense<0.000000e+00> : vector<16x100xf32>
    %10 = tpu.matmul %8, %9, %cst_7 {dimension_numbers = #tpu.dot_dimension_numbers<[1], [0], [0], [1], [0, 0, 1, 1], [], []>} : vector<16x28xf32>, vector<28x100xf32>, vector<16x100xf32> -> vector<16x100xf32>
    %11 = arith.addf %6, %10 : vector<16x100xf32>
    %c2 = arith.constant 2 : index
    %c0_8 = arith.constant 0 : index
    %c0_9 = arith.constant 0 : index
    %12 = vector.load %arg1[%c2, %c0_8, %c0_9] : memref<5x16x28xf32, #tpu.memory_space<vmem>>, vector<1x16x28xf32>
    %13 = vector.shape_cast %12 : vector<1x16x28xf32> to vector<16x28xf32>
    %14 = vector.extract_strided_slice %0 {offsets = [0, 2], sizes = [28, 100], strides = [1, 1]} : vector<28x104xf32> to vector<28x100xf32>
    %cst_10 = arith.constant dense<0.000000e+00> : vector<16x100xf32>
    %15 = tpu.matmul %13, %14, %cst_10 {dimension_numbers = #tpu.dot_dimension_numbers<[1], [0], [0], [1], [0, 0, 1, 1], [], []>} : vector<16x28xf32>, vector<28x100xf32>, vector<16x100xf32> -> vector<16x100xf32>
    %16 = arith.addf %11, %15 : vector<16x100xf32>
    %c3 = arith.constant 3 : index
    %c0_11 = arith.constant 0 : index
    %c0_12 = arith.constant 0 : index
    %17 = vector.load %arg1[%c3, %c0_11, %c0_12] : memref<5x16x28xf32, #tpu.memory_space<vmem>>, vector<1x16x28xf32>
    %18 = vector.shape_cast %17 : vector<1x16x28xf32> to vector<16x28xf32>
    %19 = vector.extract_strided_slice %0 {offsets = [0, 3], sizes = [28, 100], strides = [1, 1]} : vector<28x104xf32> to vector<28x100xf32>
    %cst_13 = arith.constant dense<0.000000e+00> : vector<16x100xf32>
    %20 = tpu.matmul %18, %19, %cst_13 {dimension_numbers = #tpu.dot_dimension_numbers<[1], [0], [0], [1], [0, 0, 1, 1], [], []>} : vector<16x28xf32>, vector<28x100xf32>, vector<16x100xf32> -> vector<16x100xf32>
    %21 = arith.addf %16, %20 : vector<16x100xf32>
    %c4 = arith.constant 4 : index
    %c0_14 = arith.constant 0 : index
    %c0_15 = arith.constant 0 : index
    %22 = vector.load %arg1[%c4, %c0_14, %c0_15] : memref<5x16x28xf32, #tpu.memory_space<vmem>>, vector<1x16x28xf32>
    %23 = vector.shape_cast %22 : vector<1x16x28xf32> to vector<16x28xf32>
    %24 = vector.extract_strided_slice %0 {offsets = [0, 4], sizes = [28, 100], strides = [1, 1]} : vector<28x104xf32> to vector<28x100xf32>
    %cst_16 = arith.constant dense<0.000000e+00> : vector<16x100xf32>
    %25 = tpu.matmul %23, %24, %cst_16 {dimension_numbers = #tpu.dot_dimension_numbers<[1], [0], [0], [1], [0, 0, 1, 1], [], []>} : vector<16x28xf32>, vector<28x100xf32>, vector<16x100xf32> -> vector<16x100xf32>
    %26 = arith.addf %21, %25 : vector<16x100xf32>
    %c0_17 = arith.constant 0 : index
    %c0_18 = arith.constant 0 : index
    %27 = vector.load %arg2[%c0_17, %c0_18] : memref<16x1xf32, #tpu.memory_space<vmem>>, vector<16x1xf32>
    %28 = vector.broadcast %27 : vector<16x1xf32> to vector<16x100xf32>
    %29 = arith.mulf %26, %28 : vector<16x100xf32>
    %c0_19 = arith.constant 0 : index
    %c0_20 = arith.constant 0 : index
    %30 = vector.load %arg3[%c0_19, %c0_20] : memref<16x1xf32, #tpu.memory_space<vmem>>, vector<16x1xf32>
    %31 = vector.broadcast %30 : vector<16x1xf32> to vector<16x100xf32>
    %32 = arith.addf %29, %31 : vector<16x100xf32>
    %cst_21 = arith.constant 0.000000e+00 : f32
    %33 = vector.broadcast %cst_21 : f32 to vector<16x100xf32>
    %34 = arith.maximumf %32, %33 : vector<16x100xf32>
    %cst_22 = arith.constant 0.000000e+00 : f32
    %35 = vector.broadcast %cst_22 : f32 to vector<32x96xf32>
    %c0_23 = arith.constant 0 : index
    %c0_24 = arith.constant 0 : index
    %c0_25 = arith.constant 0 : index
    %36 = vector.load %arg4[%c0_23, %c0_24, %c0_25] : memref<5x32x16xf32, #tpu.memory_space<vmem>>, vector<1x32x16xf32>
    %37 = vector.shape_cast %36 : vector<1x32x16xf32> to vector<32x16xf32>
    %38 = vector.extract_strided_slice %34 {offsets = [0, 0], sizes = [16, 96], strides = [1, 1]} : vector<16x100xf32> to vector<16x96xf32>
    %cst_26 = arith.constant dense<0.000000e+00> : vector<32x96xf32>
    %39 = tpu.matmul %37, %38, %cst_26 {dimension_numbers = #tpu.dot_dimension_numbers<[1], [0], [0], [1], [0, 0, 1, 1], [], []>} : vector<32x16xf32>, vector<16x96xf32>, vector<32x96xf32> -> vector<32x96xf32>
    %40 = arith.addf %35, %39 : vector<32x96xf32>
    %c1_27 = arith.constant 1 : index
    %c0_28 = arith.constant 0 : index
    %c0_29 = arith.constant 0 : index
    %41 = vector.load %arg4[%c1_27, %c0_28, %c0_29] : memref<5x32x16xf32, #tpu.memory_space<vmem>>, vector<1x32x16xf32>
    %42 = vector.shape_cast %41 : vector<1x32x16xf32> to vector<32x16xf32>
    %43 = vector.extract_strided_slice %34 {offsets = [0, 1], sizes = [16, 96], strides = [1, 1]} : vector<16x100xf32> to vector<16x96xf32>
    %cst_30 = arith.constant dense<0.000000e+00> : vector<32x96xf32>
    %44 = tpu.matmul %42, %43, %cst_30 {dimension_numbers = #tpu.dot_dimension_numbers<[1], [0], [0], [1], [0, 0, 1, 1], [], []>} : vector<32x16xf32>, vector<16x96xf32>, vector<32x96xf32> -> vector<32x96xf32>
    %45 = arith.addf %40, %44 : vector<32x96xf32>
    %c2_31 = arith.constant 2 : index
    %c0_32 = arith.constant 0 : index
    %c0_33 = arith.constant 0 : index
    %46 = vector.load %arg4[%c2_31, %c0_32, %c0_33] : memref<5x32x16xf32, #tpu.memory_space<vmem>>, vector<1x32x16xf32>
    %47 = vector.shape_cast %46 : vector<1x32x16xf32> to vector<32x16xf32>
    %48 = vector.extract_strided_slice %34 {offsets = [0, 2], sizes = [16, 96], strides = [1, 1]} : vector<16x100xf32> to vector<16x96xf32>
    %cst_34 = arith.constant dense<0.000000e+00> : vector<32x96xf32>
    %49 = tpu.matmul %47, %48, %cst_34 {dimension_numbers = #tpu.dot_dimension_numbers<[1], [0], [0], [1], [0, 0, 1, 1], [], []>} : vector<32x16xf32>, vector<16x96xf32>, vector<32x96xf32> -> vector<32x96xf32>
    %50 = arith.addf %45, %49 : vector<32x96xf32>
    %c3_35 = arith.constant 3 : index
    %c0_36 = arith.constant 0 : index
    %c0_37 = arith.constant 0 : index
    %51 = vector.load %arg4[%c3_35, %c0_36, %c0_37] : memref<5x32x16xf32, #tpu.memory_space<vmem>>, vector<1x32x16xf32>
    %52 = vector.shape_cast %51 : vector<1x32x16xf32> to vector<32x16xf32>
    %53 = vector.extract_strided_slice %34 {offsets = [0, 3], sizes = [16, 96], strides = [1, 1]} : vector<16x100xf32> to vector<16x96xf32>
    %cst_38 = arith.constant dense<0.000000e+00> : vector<32x96xf32>
    %54 = tpu.matmul %52, %53, %cst_38 {dimension_numbers = #tpu.dot_dimension_numbers<[1], [0], [0], [1], [0, 0, 1, 1], [], []>} : vector<32x16xf32>, vector<16x96xf32>, vector<32x96xf32> -> vector<32x96xf32>
    %55 = arith.addf %50, %54 : vector<32x96xf32>
    %c4_39 = arith.constant 4 : index
    %c0_40 = arith.constant 0 : index
    %c0_41 = arith.constant 0 : index
    %56 = vector.load %arg4[%c4_39, %c0_40, %c0_41] : memref<5x32x16xf32, #tpu.memory_space<vmem>>, vector<1x32x16xf32>
    %57 = vector.shape_cast %56 : vector<1x32x16xf32> to vector<32x16xf32>
    %58 = vector.extract_strided_slice %34 {offsets = [0, 4], sizes = [16, 96], strides = [1, 1]} : vector<16x100xf32> to vector<16x96xf32>
    %cst_42 = arith.constant dense<0.000000e+00> : vector<32x96xf32>
    %59 = tpu.matmul %57, %58, %cst_42 {dimension_numbers = #tpu.dot_dimension_numbers<[1], [0], [0], [1], [0, 0, 1, 1], [], []>} : vector<32x16xf32>, vector<16x96xf32>, vector<32x96xf32> -> vector<32x96xf32>
    %60 = arith.addf %55, %59 : vector<32x96xf32>
    %c0_43 = arith.constant 0 : index
    %c0_44 = arith.constant 0 : index
    %61 = vector.load %arg5[%c0_43, %c0_44] : memref<32x1xf32, #tpu.memory_space<vmem>>, vector<32x1xf32>
    %62 = vector.broadcast %61 : vector<32x1xf32> to vector<32x96xf32>
    %63 = arith.mulf %60, %62 : vector<32x96xf32>
    %c0_45 = arith.constant 0 : index
    %c0_46 = arith.constant 0 : index
    %64 = vector.load %arg6[%c0_45, %c0_46] : memref<32x1xf32, #tpu.memory_space<vmem>>, vector<32x1xf32>
    %65 = vector.broadcast %64 : vector<32x1xf32> to vector<32x96xf32>
    %66 = arith.addf %63, %65 : vector<32x96xf32>
    %cst_47 = arith.constant 0.000000e+00 : f32
    %67 = vector.broadcast %cst_47 : f32 to vector<32x96xf32>
    %68 = arith.maximumf %66, %67 : vector<32x96xf32>
    %69 = vector.extract_strided_slice %68 {offsets = [0, 0], sizes = [1, 42], strides = [1, 1]} : vector<32x96xf32> to vector<1x42xf32>
    %c0_48 = arith.constant 0 : index
    %c0_49 = arith.constant 0 : index
    %70 = vector.load %arg12[%c0_48, %c0_49] : memref<2x1344xf32, #tpu.memory_space<vmem>>, vector<1x42xf32>
    tpu.vector_store %arg12[%c0_48, %c0_49], %69 {strides = array<i32>} : memref<2x1344xf32, #tpu.memory_space<vmem>>, vector<1x42xf32>,
    %71 = vector.extract_strided_slice %68 {offsets = [1, 0], sizes = [1, 42], strides = [1, 1]} : vector<32x96xf32> to vector<1x42xf32>
    %c0_50 = arith.constant 0 : index
    %c42 = arith.constant 42 : index
    %72 = vector.load %arg12[%c0_50, %c42] : memref<2x1344xf32, #tpu.memory_space<vmem>>, vector<1x42xf32>
    tpu.vector_store %arg12[%c0_50, %c42], %71 {strides = array<i32>} : memref<2x1344xf32, #tpu.memory_space<vmem>>, vector<1x42xf32>,
    %73 = vector.extract_strided_slice %68 {offsets = [2, 0], sizes = [1, 42], strides = [1, 1]} : vector<32x96xf32> to vector<1x42xf32>
    %c0_51 = arith.constant 0 : index
    %c84 = arith.constant 84 : index
    %74 = vector.load %arg12[%c0_51, %c84] : memref<2x1344xf32, #tpu.memory_space<vmem>>, vector<1x42xf32>
    tpu.vector_store %arg12[%c0_51, %c84], %73 {strides = array<i32>} : memref<2x1344xf32, #tpu.memory_space<vmem>>, vector<1x42xf32>,
    %75 = vector.extract_strided_slice %68 {offsets = [3, 0], sizes = [1, 42], strides = [1, 1]} : vector<32x96xf32> to vector<1x42xf32>
    %c0_52 = arith.constant 0 : index
    %c126 = arith.constant 126 : index
    %76 = vector.load %arg12[%c0_52, %c126] : memref<2x1344xf32, #tpu.memory_space<vmem>>, vector<1x42xf32>
    tpu.vector_store %arg12[%c0_52, %c126], %75 {strides = array<i32>} : memref<2x1344xf32, #tpu.memory_space<vmem>>, vector<1x42xf32>,
    %77 = vector.extract_strided_slice %68 {offsets = [4, 0], sizes = [1, 42], strides = [1, 1]} : vector<32x96xf32> to vector<1x42xf32>
    %c0_53 = arith.constant 0 : index
    %c168 = arith.constant 168 : index
    %78 = vector.load %arg12[%c0_53, %c168] : memref<2x1344xf32, #tpu.memory_space<vmem>>, vector<1x42xf32>
    tpu.vector_store %arg12[%c0_53, %c168], %77 {strides = array<i32>} : memref<2x1344xf32, #tpu.memory_space<vmem>>, vector<1x42xf32>,
    %79 = vector.extract_strided_slice %68 {offsets = [5, 0], sizes = [1, 42], strides = [1, 1]} : vector<32x96xf32> to vector<1x42xf32>
    %c0_54 = arith.constant 0 : index
    %c210 = arith.constant 210 : index
    %80 = vector.load %arg12[%c0_54, %c210] : memref<2x1344xf32, #tpu.memory_space<vmem>>, vector<1x42xf32>
    tpu.vector_store %arg12[%c0_54, %c210], %79 {strides = array<i32>} : memref<2x1344xf32, #tpu.memory_space<vmem>>, vector<1x42xf32>,
    %81 = vector.extract_strided_slice %68 {offsets = [6, 0], sizes = [1, 42], strides = [1, 1]} : vector<32x96xf32> to vector<1x42xf32>
    %c0_55 = arith.constant 0 : index
    %c252 = arith.constant 252 : index
    %82 = vector.load %arg12[%c0_55, %c252] : memref<2x1344xf32, #tpu.memory_space<vmem>>, vector<1x42xf32>
    tpu.vector_store %arg12[%c0_55, %c252], %81 {strides = array<i32>} : memref<2x1344xf32, #tpu.memory_space<vmem>>, vector<1x42xf32>,
    %83 = vector.extract_strided_slice %68 {offsets = [7, 0], sizes = [1, 42], strides = [1, 1]} : vector<32x96xf32> to vector<1x42xf32>
    %c0_56 = arith.constant 0 : index
    %c294 = arith.constant 294 : index
    %84 = vector.load %arg12[%c0_56, %c294] : memref<2x1344xf32, #tpu.memory_space<vmem>>, vector<1x42xf32>
    tpu.vector_store %arg12[%c0_56, %c294], %83 {strides = array<i32>} : memref<2x1344xf32, #tpu.memory_space<vmem>>, vector<1x42xf32>,
    %85 = vector.extract_strided_slice %68 {offsets = [8, 0], sizes = [1, 42], strides = [1, 1]} : vector<32x96xf32> to vector<1x42xf32>
    %c0_57 = arith.constant 0 : index
    %c336 = arith.constant 336 : index
    %86 = vector.load %arg12[%c0_57, %c336] : memref<2x1344xf32, #tpu.memory_space<vmem>>, vector<1x42xf32>
    tpu.vector_store %arg12[%c0_57, %c336], %85 {strides = array<i32>} : memref<2x1344xf32, #tpu.memory_space<vmem>>, vector<1x42xf32>,
    %87 = vector.extract_strided_slice %68 {offsets = [9, 0], sizes = [1, 42], strides = [1, 1]} : vector<32x96xf32> to vector<1x42xf32>
    %c0_58 = arith.constant 0 : index
    %c378 = arith.constant 378 : index
    %88 = vector.load %arg12[%c0_58, %c378] : memref<2x1344xf32, #tpu.memory_space<vmem>>, vector<1x42xf32>
    tpu.vector_store %arg12[%c0_58, %c378], %87 {strides = array<i32>} : memref<2x1344xf32, #tpu.memory_space<vmem>>, vector<1x42xf32>,
    %89 = vector.extract_strided_slice %68 {offsets = [10, 0], sizes = [1, 42], strides = [1, 1]} : vector<32x96xf32> to vector<1x42xf32>
    %c0_59 = arith.constant 0 : index
    %c420 = arith.constant 420 : index
    %90 = vector.load %arg12[%c0_59, %c420] : memref<2x1344xf32, #tpu.memory_space<vmem>>, vector<1x42xf32>
    tpu.vector_store %arg12[%c0_59, %c420], %89 {strides = array<i32>} : memref<2x1344xf32, #tpu.memory_space<vmem>>, vector<1x42xf32>,
    %91 = vector.extract_strided_slice %68 {offsets = [11, 0], sizes = [1, 42], strides = [1, 1]} : vector<32x96xf32> to vector<1x42xf32>
    %c0_60 = arith.constant 0 : index
    %c462 = arith.constant 462 : index
    %92 = vector.load %arg12[%c0_60, %c462] : memref<2x1344xf32, #tpu.memory_space<vmem>>, vector<1x42xf32>
    tpu.vector_store %arg12[%c0_60, %c462], %91 {strides = array<i32>} : memref<2x1344xf32, #tpu.memory_space<vmem>>, vector<1x42xf32>,
    %93 = vector.extract_strided_slice %68 {offsets = [12, 0], sizes = [1, 42], strides = [1, 1]} : vector<32x96xf32> to vector<1x42xf32>
    %c0_61 = arith.constant 0 : index
    %c504 = arith.constant 504 : index
    %94 = vector.load %arg12[%c0_61, %c504] : memref<2x1344xf32, #tpu.memory_space<vmem>>, vector<1x42xf32>
    tpu.vector_store %arg12[%c0_61, %c504], %93 {strides = array<i32>} : memref<2x1344xf32, #tpu.memory_space<vmem>>, vector<1x42xf32>,
    %95 = vector.extract_strided_slice %68 {offsets = [13, 0], sizes = [1, 42], strides = [1, 1]} : vector<32x96xf32> to vector<1x42xf32>
    %c0_62 = arith.constant 0 : index
    %c546 = arith.constant 546 : index
    %96 = vector.load %arg12[%c0_62, %c546] : memref<2x1344xf32, #tpu.memory_space<vmem>>, vector<1x42xf32>
    tpu.vector_store %arg12[%c0_62, %c546], %95 {strides = array<i32>} : memref<2x1344xf32, #tpu.memory_space<vmem>>, vector<1x42xf32>,
    %97 = vector.extract_strided_slice %68 {offsets = [14, 0], sizes = [1, 42], strides = [1, 1]} : vector<32x96xf32> to vector<1x42xf32>
    %c0_63 = arith.constant 0 : index
    %c588 = arith.constant 588 : index
    %98 = vector.load %arg12[%c0_63, %c588] : memref<2x1344xf32, #tpu.memory_space<vmem>>, vector<1x42xf32>
    tpu.vector_store %arg12[%c0_63, %c588], %97 {strides = array<i32>} : memref<2x1344xf32, #tpu.memory_space<vmem>>, vector<1x42xf32>,
    %99 = vector.extract_strided_slice %68 {offsets = [15, 0], sizes = [1, 42], strides = [1, 1]} : vector<32x96xf32> to vector<1x42xf32>
    %c0_64 = arith.constant 0 : index
    %c630 = arith.constant 630 : index
    %100 = vector.load %arg12[%c0_64, %c630] : memref<2x1344xf32, #tpu.memory_space<vmem>>, vector<1x42xf32>
    tpu.vector_store %arg12[%c0_64, %c630], %99 {strides = array<i32>} : memref<2x1344xf32, #tpu.memory_space<vmem>>, vector<1x42xf32>,
    %101 = vector.extract_strided_slice %68 {offsets = [16, 0], sizes = [1, 42], strides = [1, 1]} : vector<32x96xf32> to vector<1x42xf32>
    %c0_65 = arith.constant 0 : index
    %c672 = arith.constant 672 : index
    %102 = vector.load %arg12[%c0_65, %c672] : memref<2x1344xf32, #tpu.memory_space<vmem>>, vector<1x42xf32>
    tpu.vector_store %arg12[%c0_65, %c672], %101 {strides = array<i32>} : memref<2x1344xf32, #tpu.memory_space<vmem>>, vector<1x42xf32>,
    %103 = vector.extract_strided_slice %68 {offsets = [17, 0], sizes = [1, 42], strides = [1, 1]} : vector<32x96xf32> to vector<1x42xf32>
    %c0_66 = arith.constant 0 : index
    %c714 = arith.constant 714 : index
    %104 = vector.load %arg12[%c0_66, %c714] : memref<2x1344xf32, #tpu.memory_space<vmem>>, vector<1x42xf32>
    tpu.vector_store %arg12[%c0_66, %c714], %103 {strides = array<i32>} : memref<2x1344xf32, #tpu.memory_space<vmem>>, vector<1x42xf32>,
    %105 = vector.extract_strided_slice %68 {offsets = [18, 0], sizes = [1, 42], strides = [1, 1]} : vector<32x96xf32> to vector<1x42xf32>
    %c0_67 = arith.constant 0 : index
    %c756 = arith.constant 756 : index
    %106 = vector.load %arg12[%c0_67, %c756] : memref<2x1344xf32, #tpu.memory_space<vmem>>, vector<1x42xf32>
    tpu.vector_store %arg12[%c0_67, %c756], %105 {strides = array<i32>} : memref<2x1344xf32, #tpu.memory_space<vmem>>, vector<1x42xf32>,
    %107 = vector.extract_strided_slice %68 {offsets = [19, 0], sizes = [1, 42], strides = [1, 1]} : vector<32x96xf32> to vector<1x42xf32>
    %c0_68 = arith.constant 0 : index
    %c798 = arith.constant 798 : index
    %108 = vector.load %arg12[%c0_68, %c798] : memref<2x1344xf32, #tpu.memory_space<vmem>>, vector<1x42xf32>
    tpu.vector_store %arg12[%c0_68, %c798], %107 {strides = array<i32>} : memref<2x1344xf32, #tpu.memory_space<vmem>>, vector<1x42xf32>,
    %109 = vector.extract_strided_slice %68 {offsets = [20, 0], sizes = [1, 42], strides = [1, 1]} : vector<32x96xf32> to vector<1x42xf32>
    %c0_69 = arith.constant 0 : index
    %c840 = arith.constant 840 : index
    %110 = vector.load %arg12[%c0_69, %c840] : memref<2x1344xf32, #tpu.memory_space<vmem>>, vector<1x42xf32>
    tpu.vector_store %arg12[%c0_69, %c840], %109 {strides = array<i32>} : memref<2x1344xf32, #tpu.memory_space<vmem>>, vector<1x42xf32>,
    %111 = vector.extract_strided_slice %68 {offsets = [21, 0], sizes = [1, 42], strides = [1, 1]} : vector<32x96xf32> to vector<1x42xf32>
    %c0_70 = arith.constant 0 : index
    %c882 = arith.constant 882 : index
    %112 = vector.load %arg12[%c0_70, %c882] : memref<2x1344xf32, #tpu.memory_space<vmem>>, vector<1x42xf32>
    tpu.vector_store %arg12[%c0_70, %c882], %111 {strides = array<i32>} : memref<2x1344xf32, #tpu.memory_space<vmem>>, vector<1x42xf32>,
    %113 = vector.extract_strided_slice %68 {offsets = [22, 0], sizes = [1, 42], strides = [1, 1]} : vector<32x96xf32> to vector<1x42xf32>
    %c0_71 = arith.constant 0 : index
    %c924 = arith.constant 924 : index
    %114 = vector.load %arg12[%c0_71, %c924] : memref<2x1344xf32, #tpu.memory_space<vmem>>, vector<1x42xf32>
    tpu.vector_store %arg12[%c0_71, %c924], %113 {strides = array<i32>} : memref<2x1344xf32, #tpu.memory_space<vmem>>, vector<1x42xf32>,
    %115 = vector.extract_strided_slice %68 {offsets = [23, 0], sizes = [1, 42], strides = [1, 1]} : vector<32x96xf32> to vector<1x42xf32>
    %c0_72 = arith.constant 0 : index
    %c966 = arith.constant 966 : index
    %116 = vector.load %arg12[%c0_72, %c966] : memref<2x1344xf32, #tpu.memory_space<vmem>>, vector<1x42xf32>
    tpu.vector_store %arg12[%c0_72, %c966], %115 {strides = array<i32>} : memref<2x1344xf32, #tpu.memory_space<vmem>>, vector<1x42xf32>,
    %117 = vector.extract_strided_slice %68 {offsets = [24, 0], sizes = [1, 42], strides = [1, 1]} : vector<32x96xf32> to vector<1x42xf32>
    %c0_73 = arith.constant 0 : index
    %c1008 = arith.constant 1008 : index
    %118 = vector.load %arg12[%c0_73, %c1008] : memref<2x1344xf32, #tpu.memory_space<vmem>>, vector<1x42xf32>
    tpu.vector_store %arg12[%c0_73, %c1008], %117 {strides = array<i32>} : memref<2x1344xf32, #tpu.memory_space<vmem>>, vector<1x42xf32>,
    %119 = vector.extract_strided_slice %68 {offsets = [25, 0], sizes = [1, 42], strides = [1, 1]} : vector<32x96xf32> to vector<1x42xf32>
    %c0_74 = arith.constant 0 : index
    %c1050 = arith.constant 1050 : index
    %120 = vector.load %arg12[%c0_74, %c1050] : memref<2x1344xf32, #tpu.memory_space<vmem>>, vector<1x42xf32>
    tpu.vector_store %arg12[%c0_74, %c1050], %119 {strides = array<i32>} : memref<2x1344xf32, #tpu.memory_space<vmem>>, vector<1x42xf32>,
    %121 = vector.extract_strided_slice %68 {offsets = [26, 0], sizes = [1, 42], strides = [1, 1]} : vector<32x96xf32> to vector<1x42xf32>
    %c0_75 = arith.constant 0 : index
    %c1092 = arith.constant 1092 : index
    %122 = vector.load %arg12[%c0_75, %c1092] : memref<2x1344xf32, #tpu.memory_space<vmem>>, vector<1x42xf32>
    tpu.vector_store %arg12[%c0_75, %c1092], %121 {strides = array<i32>} : memref<2x1344xf32, #tpu.memory_space<vmem>>, vector<1x42xf32>,
    %123 = vector.extract_strided_slice %68 {offsets = [27, 0], sizes = [1, 42], strides = [1, 1]} : vector<32x96xf32> to vector<1x42xf32>
    %c0_76 = arith.constant 0 : index
    %c1134 = arith.constant 1134 : index
    %124 = vector.load %arg12[%c0_76, %c1134] : memref<2x1344xf32, #tpu.memory_space<vmem>>, vector<1x42xf32>
    tpu.vector_store %arg12[%c0_76, %c1134], %123 {strides = array<i32>} : memref<2x1344xf32, #tpu.memory_space<vmem>>, vector<1x42xf32>,
    %125 = vector.extract_strided_slice %68 {offsets = [28, 0], sizes = [1, 42], strides = [1, 1]} : vector<32x96xf32> to vector<1x42xf32>
    %c0_77 = arith.constant 0 : index
    %c1176 = arith.constant 1176 : index
    %126 = vector.load %arg12[%c0_77, %c1176] : memref<2x1344xf32, #tpu.memory_space<vmem>>, vector<1x42xf32>
    tpu.vector_store %arg12[%c0_77, %c1176], %125 {strides = array<i32>} : memref<2x1344xf32, #tpu.memory_space<vmem>>, vector<1x42xf32>,
    %127 = vector.extract_strided_slice %68 {offsets = [29, 0], sizes = [1, 42], strides = [1, 1]} : vector<32x96xf32> to vector<1x42xf32>
    %c0_78 = arith.constant 0 : index
    %c1218 = arith.constant 1218 : index
    %128 = vector.load %arg12[%c0_78, %c1218] : memref<2x1344xf32, #tpu.memory_space<vmem>>, vector<1x42xf32>
    tpu.vector_store %arg12[%c0_78, %c1218], %127 {strides = array<i32>} : memref<2x1344xf32, #tpu.memory_space<vmem>>, vector<1x42xf32>,
    %129 = vector.extract_strided_slice %68 {offsets = [30, 0], sizes = [1, 42], strides = [1, 1]} : vector<32x96xf32> to vector<1x42xf32>
    %c0_79 = arith.constant 0 : index
    %c1260 = arith.constant 1260 : index
    %130 = vector.load %arg12[%c0_79, %c1260] : memref<2x1344xf32, #tpu.memory_space<vmem>>, vector<1x42xf32>
    tpu.vector_store %arg12[%c0_79, %c1260], %129 {strides = array<i32>} : memref<2x1344xf32, #tpu.memory_space<vmem>>, vector<1x42xf32>,
    %131 = vector.extract_strided_slice %68 {offsets = [31, 0], sizes = [1, 42], strides = [1, 1]} : vector<32x96xf32> to vector<1x42xf32>
    %c0_80 = arith.constant 0 : index
    %c1302 = arith.constant 1302 : index
    %132 = vector.load %arg12[%c0_80, %c1302] : memref<2x1344xf32, #tpu.memory_space<vmem>>, vector<1x42xf32>
    tpu.vector_store %arg12[%c0_80, %c1302], %131 {strides = array<i32>} : memref<2x1344xf32, #tpu.memory_space<vmem>>, vector<1x42xf32>,
    %133 = vector.extract_strided_slice %68 {offsets = [0, 50], sizes = [1, 42], strides = [1, 1]} : vector<32x96xf32> to vector<1x42xf32>
    %c1_81 = arith.constant 1 : index
    %c0_82 = arith.constant 0 : index
    %134 = vector.load %arg12[%c1_81, %c0_82] : memref<2x1344xf32, #tpu.memory_space<vmem>>, vector<1x42xf32>
    tpu.vector_store %arg12[%c1_81, %c0_82], %133 {strides = array<i32>} : memref<2x1344xf32, #tpu.memory_space<vmem>>, vector<1x42xf32>,
    %135 = vector.extract_strided_slice %68 {offsets = [1, 50], sizes = [1, 42], strides = [1, 1]} : vector<32x96xf32> to vector<1x42xf32>
    %c1_83 = arith.constant 1 : index
    %c42_84 = arith.constant 42 : index
    %136 = vector.load %arg12[%c1_83, %c42_84] : memref<2x1344xf32, #tpu.memory_space<vmem>>, vector<1x42xf32>
    tpu.vector_store %arg12[%c1_83, %c42_84], %135 {strides = array<i32>} : memref<2x1344xf32, #tpu.memory_space<vmem>>, vector<1x42xf32>,
    %137 = vector.extract_strided_slice %68 {offsets = [2, 50], sizes = [1, 42], strides = [1, 1]} : vector<32x96xf32> to vector<1x42xf32>
    %c1_85 = arith.constant 1 : index
    %c84_86 = arith.constant 84 : index
    %138 = vector.load %arg12[%c1_85, %c84_86] : memref<2x1344xf32, #tpu.memory_space<vmem>>, vector<1x42xf32>
    tpu.vector_store %arg12[%c1_85, %c84_86], %137 {strides = array<i32>} : memref<2x1344xf32, #tpu.memory_space<vmem>>, vector<1x42xf32>,
    %139 = vector.extract_strided_slice %68 {offsets = [3, 50], sizes = [1, 42], strides = [1, 1]} : vector<32x96xf32> to vector<1x42xf32>
    %c1_87 = arith.constant 1 : index
    %c126_88 = arith.constant 126 : index
    %140 = vector.load %arg12[%c1_87, %c126_88] : memref<2x1344xf32, #tpu.memory_space<vmem>>, vector<1x42xf32>
    tpu.vector_store %arg12[%c1_87, %c126_88], %139 {strides = array<i32>} : memref<2x1344xf32, #tpu.memory_space<vmem>>, vector<1x42xf32>,
    %141 = vector.extract_strided_slice %68 {offsets = [4, 50], sizes = [1, 42], strides = [1, 1]} : vector<32x96xf32> to vector<1x42xf32>
    %c1_89 = arith.constant 1 : index
    %c168_90 = arith.constant 168 : index
    %142 = vector.load %arg12[%c1_89, %c168_90] : memref<2x1344xf32, #tpu.memory_space<vmem>>, vector<1x42xf32>
    tpu.vector_store %arg12[%c1_89, %c168_90], %141 {strides = array<i32>} : memref<2x1344xf32, #tpu.memory_space<vmem>>, vector<1x42xf32>,
    %143 = vector.extract_strided_slice %68 {offsets = [5, 50], sizes = [1, 42], strides = [1, 1]} : vector<32x96xf32> to vector<1x42xf32>
    %c1_91 = arith.constant 1 : index
    %c210_92 = arith.constant 210 : index
    %144 = vector.load %arg12[%c1_91, %c210_92] : memref<2x1344xf32, #tpu.memory_space<vmem>>, vector<1x42xf32>
    tpu.vector_store %arg12[%c1_91, %c210_92], %143 {strides = array<i32>} : memref<2x1344xf32, #tpu.memory_space<vmem>>, vector<1x42xf32>,
    %145 = vector.extract_strided_slice %68 {offsets = [6, 50], sizes = [1, 42], strides = [1, 1]} : vector<32x96xf32> to vector<1x42xf32>
    %c1_93 = arith.constant 1 : index
    %c252_94 = arith.constant 252 : index
    %146 = vector.load %arg12[%c1_93, %c252_94] : memref<2x1344xf32, #tpu.memory_space<vmem>>, vector<1x42xf32>
    tpu.vector_store %arg12[%c1_93, %c252_94], %145 {strides = array<i32>} : memref<2x1344xf32, #tpu.memory_space<vmem>>, vector<1x42xf32>,
    %147 = vector.extract_strided_slice %68 {offsets = [7, 50], sizes = [1, 42], strides = [1, 1]} : vector<32x96xf32> to vector<1x42xf32>
    %c1_95 = arith.constant 1 : index
    %c294_96 = arith.constant 294 : index
    %148 = vector.load %arg12[%c1_95, %c294_96] : memref<2x1344xf32, #tpu.memory_space<vmem>>, vector<1x42xf32>
    tpu.vector_store %arg12[%c1_95, %c294_96], %147 {strides = array<i32>} : memref<2x1344xf32, #tpu.memory_space<vmem>>, vector<1x42xf32>,
    %149 = vector.extract_strided_slice %68 {offsets = [8, 50], sizes = [1, 42], strides = [1, 1]} : vector<32x96xf32> to vector<1x42xf32>
    %c1_97 = arith.constant 1 : index
    %c336_98 = arith.constant 336 : index
    %150 = vector.load %arg12[%c1_97, %c336_98] : memref<2x1344xf32, #tpu.memory_space<vmem>>, vector<1x42xf32>
    tpu.vector_store %arg12[%c1_97, %c336_98], %149 {strides = array<i32>} : memref<2x1344xf32, #tpu.memory_space<vmem>>, vector<1x42xf32>,
    %151 = vector.extract_strided_slice %68 {offsets = [9, 50], sizes = [1, 42], strides = [1, 1]} : vector<32x96xf32> to vector<1x42xf32>
    %c1_99 = arith.constant 1 : index
    %c378_100 = arith.constant 378 : index
    %152 = vector.load %arg12[%c1_99, %c378_100] : memref<2x1344xf32, #tpu.memory_space<vmem>>, vector<1x42xf32>
    tpu.vector_store %arg12[%c1_99, %c378_100], %151 {strides = array<i32>} : memref<2x1344xf32, #tpu.memory_space<vmem>>, vector<1x42xf32>,
    %153 = vector.extract_strided_slice %68 {offsets = [10, 50], sizes = [1, 42], strides = [1, 1]} : vector<32x96xf32> to vector<1x42xf32>
    %c1_101 = arith.constant 1 : index
    %c420_102 = arith.constant 420 : index
    %154 = vector.load %arg12[%c1_101, %c420_102] : memref<2x1344xf32, #tpu.memory_space<vmem>>, vector<1x42xf32>
    tpu.vector_store %arg12[%c1_101, %c420_102], %153 {strides = array<i32>} : memref<2x1344xf32, #tpu.memory_space<vmem>>, vector<1x42xf32>,
    %155 = vector.extract_strided_slice %68 {offsets = [11, 50], sizes = [1, 42], strides = [1, 1]} : vector<32x96xf32> to vector<1x42xf32>
    %c1_103 = arith.constant 1 : index
    %c462_104 = arith.constant 462 : index
    %156 = vector.load %arg12[%c1_103, %c462_104] : memref<2x1344xf32, #tpu.memory_space<vmem>>, vector<1x42xf32>
    tpu.vector_store %arg12[%c1_103, %c462_104], %155 {strides = array<i32>} : memref<2x1344xf32, #tpu.memory_space<vmem>>, vector<1x42xf32>,
    %157 = vector.extract_strided_slice %68 {offsets = [12, 50], sizes = [1, 42], strides = [1, 1]} : vector<32x96xf32> to vector<1x42xf32>
    %c1_105 = arith.constant 1 : index
    %c504_106 = arith.constant 504 : index
    %158 = vector.load %arg12[%c1_105, %c504_106] : memref<2x1344xf32, #tpu.memory_space<vmem>>, vector<1x42xf32>
    tpu.vector_store %arg12[%c1_105, %c504_106], %157 {strides = array<i32>} : memref<2x1344xf32, #tpu.memory_space<vmem>>, vector<1x42xf32>,
    %159 = vector.extract_strided_slice %68 {offsets = [13, 50], sizes = [1, 42], strides = [1, 1]} : vector<32x96xf32> to vector<1x42xf32>
    %c1_107 = arith.constant 1 : index
    %c546_108 = arith.constant 546 : index
    %160 = vector.load %arg12[%c1_107, %c546_108] : memref<2x1344xf32, #tpu.memory_space<vmem>>, vector<1x42xf32>
    tpu.vector_store %arg12[%c1_107, %c546_108], %159 {strides = array<i32>} : memref<2x1344xf32, #tpu.memory_space<vmem>>, vector<1x42xf32>,
    %161 = vector.extract_strided_slice %68 {offsets = [14, 50], sizes = [1, 42], strides = [1, 1]} : vector<32x96xf32> to vector<1x42xf32>
    %c1_109 = arith.constant 1 : index
    %c588_110 = arith.constant 588 : index
    %162 = vector.load %arg12[%c1_109, %c588_110] : memref<2x1344xf32, #tpu.memory_space<vmem>>, vector<1x42xf32>
    tpu.vector_store %arg12[%c1_109, %c588_110], %161 {strides = array<i32>} : memref<2x1344xf32, #tpu.memory_space<vmem>>, vector<1x42xf32>,
    %163 = vector.extract_strided_slice %68 {offsets = [15, 50], sizes = [1, 42], strides = [1, 1]} : vector<32x96xf32> to vector<1x42xf32>
    %c1_111 = arith.constant 1 : index
    %c630_112 = arith.constant 630 : index
    %164 = vector.load %arg12[%c1_111, %c630_112] : memref<2x1344xf32, #tpu.memory_space<vmem>>, vector<1x42xf32>
    tpu.vector_store %arg12[%c1_111, %c630_112], %163 {strides = array<i32>} : memref<2x1344xf32, #tpu.memory_space<vmem>>, vector<1x42xf32>,
    %165 = vector.extract_strided_slice %68 {offsets = [16, 50], sizes = [1, 42], strides = [1, 1]} : vector<32x96xf32> to vector<1x42xf32>
    %c1_113 = arith.constant 1 : index
    %c672_114 = arith.constant 672 : index
    %166 = vector.load %arg12[%c1_113, %c672_114] : memref<2x1344xf32, #tpu.memory_space<vmem>>, vector<1x42xf32>
    tpu.vector_store %arg12[%c1_113, %c672_114], %165 {strides = array<i32>} : memref<2x1344xf32, #tpu.memory_space<vmem>>, vector<1x42xf32>,
    %167 = vector.extract_strided_slice %68 {offsets = [17, 50], sizes = [1, 42], strides = [1, 1]} : vector<32x96xf32> to vector<1x42xf32>
    %c1_115 = arith.constant 1 : index
    %c714_116 = arith.constant 714 : index
    %168 = vector.load %arg12[%c1_115, %c714_116] : memref<2x1344xf32, #tpu.memory_space<vmem>>, vector<1x42xf32>
    tpu.vector_store %arg12[%c1_115, %c714_116], %167 {strides = array<i32>} : memref<2x1344xf32, #tpu.memory_space<vmem>>, vector<1x42xf32>,
    %169 = vector.extract_strided_slice %68 {offsets = [18, 50], sizes = [1, 42], strides = [1, 1]} : vector<32x96xf32> to vector<1x42xf32>
    %c1_117 = arith.constant 1 : index
    %c756_118 = arith.constant 756 : index
    %170 = vector.load %arg12[%c1_117, %c756_118] : memref<2x1344xf32, #tpu.memory_space<vmem>>, vector<1x42xf32>
    tpu.vector_store %arg12[%c1_117, %c756_118], %169 {strides = array<i32>} : memref<2x1344xf32, #tpu.memory_space<vmem>>, vector<1x42xf32>,
    %171 = vector.extract_strided_slice %68 {offsets = [19, 50], sizes = [1, 42], strides = [1, 1]} : vector<32x96xf32> to vector<1x42xf32>
    %c1_119 = arith.constant 1 : index
    %c798_120 = arith.constant 798 : index
    %172 = vector.load %arg12[%c1_119, %c798_120] : memref<2x1344xf32, #tpu.memory_space<vmem>>, vector<1x42xf32>
    tpu.vector_store %arg12[%c1_119, %c798_120], %171 {strides = array<i32>} : memref<2x1344xf32, #tpu.memory_space<vmem>>, vector<1x42xf32>,
    %173 = vector.extract_strided_slice %68 {offsets = [20, 50], sizes = [1, 42], strides = [1, 1]} : vector<32x96xf32> to vector<1x42xf32>
    %c1_121 = arith.constant 1 : index
    %c840_122 = arith.constant 840 : index
    %174 = vector.load %arg12[%c1_121, %c840_122] : memref<2x1344xf32, #tpu.memory_space<vmem>>, vector<1x42xf32>
    tpu.vector_store %arg12[%c1_121, %c840_122], %173 {strides = array<i32>} : memref<2x1344xf32, #tpu.memory_space<vmem>>, vector<1x42xf32>,
    %175 = vector.extract_strided_slice %68 {offsets = [21, 50], sizes = [1, 42], strides = [1, 1]} : vector<32x96xf32> to vector<1x42xf32>
    %c1_123 = arith.constant 1 : index
    %c882_124 = arith.constant 882 : index
    %176 = vector.load %arg12[%c1_123, %c882_124] : memref<2x1344xf32, #tpu.memory_space<vmem>>, vector<1x42xf32>
    tpu.vector_store %arg12[%c1_123, %c882_124], %175 {strides = array<i32>} : memref<2x1344xf32, #tpu.memory_space<vmem>>, vector<1x42xf32>,
    %177 = vector.extract_strided_slice %68 {offsets = [22, 50], sizes = [1, 42], strides = [1, 1]} : vector<32x96xf32> to vector<1x42xf32>
    %c1_125 = arith.constant 1 : index
    %c924_126 = arith.constant 924 : index
    %178 = vector.load %arg12[%c1_125, %c924_126] : memref<2x1344xf32, #tpu.memory_space<vmem>>, vector<1x42xf32>
    tpu.vector_store %arg12[%c1_125, %c924_126], %177 {strides = array<i32>} : memref<2x1344xf32, #tpu.memory_space<vmem>>, vector<1x42xf32>,
    %179 = vector.extract_strided_slice %68 {offsets = [23, 50], sizes = [1, 42], strides = [1, 1]} : vector<32x96xf32> to vector<1x42xf32>
    %c1_127 = arith.constant 1 : index
    %c966_128 = arith.constant 966 : index
    %180 = vector.load %arg12[%c1_127, %c966_128] : memref<2x1344xf32, #tpu.memory_space<vmem>>, vector<1x42xf32>
    tpu.vector_store %arg12[%c1_127, %c966_128], %179 {strides = array<i32>} : memref<2x1344xf32, #tpu.memory_space<vmem>>, vector<1x42xf32>,
    %181 = vector.extract_strided_slice %68 {offsets = [24, 50], sizes = [1, 42], strides = [1, 1]} : vector<32x96xf32> to vector<1x42xf32>
    %c1_129 = arith.constant 1 : index
    %c1008_130 = arith.constant 1008 : index
    %182 = vector.load %arg12[%c1_129, %c1008_130] : memref<2x1344xf32, #tpu.memory_space<vmem>>, vector<1x42xf32>
    tpu.vector_store %arg12[%c1_129, %c1008_130], %181 {strides = array<i32>} : memref<2x1344xf32, #tpu.memory_space<vmem>>, vector<1x42xf32>,
    %183 = vector.extract_strided_slice %68 {offsets = [25, 50], sizes = [1, 42], strides = [1, 1]} : vector<32x96xf32> to vector<1x42xf32>
    %c1_131 = arith.constant 1 : index
    %c1050_132 = arith.constant 1050 : index
    %184 = vector.load %arg12[%c1_131, %c1050_132] : memref<2x1344xf32, #tpu.memory_space<vmem>>, vector<1x42xf32>
    tpu.vector_store %arg12[%c1_131, %c1050_132], %183 {strides = array<i32>} : memref<2x1344xf32, #tpu.memory_space<vmem>>, vector<1x42xf32>,
    %185 = vector.extract_strided_slice %68 {offsets = [26, 50], sizes = [1, 42], strides = [1, 1]} : vector<32x96xf32> to vector<1x42xf32>
    %c1_133 = arith.constant 1 : index
    %c1092_134 = arith.constant 1092 : index
    %186 = vector.load %arg12[%c1_133, %c1092_134] : memref<2x1344xf32, #tpu.memory_space<vmem>>, vector<1x42xf32>
    tpu.vector_store %arg12[%c1_133, %c1092_134], %185 {strides = array<i32>} : memref<2x1344xf32, #tpu.memory_space<vmem>>, vector<1x42xf32>,
    %187 = vector.extract_strided_slice %68 {offsets = [27, 50], sizes = [1, 42], strides = [1, 1]} : vector<32x96xf32> to vector<1x42xf32>
    %c1_135 = arith.constant 1 : index
    %c1134_136 = arith.constant 1134 : index
    %188 = vector.load %arg12[%c1_135, %c1134_136] : memref<2x1344xf32, #tpu.memory_space<vmem>>, vector<1x42xf32>
    tpu.vector_store %arg12[%c1_135, %c1134_136], %187 {strides = array<i32>} : memref<2x1344xf32, #tpu.memory_space<vmem>>, vector<1x42xf32>,
    %189 = vector.extract_strided_slice %68 {offsets = [28, 50], sizes = [1, 42], strides = [1, 1]} : vector<32x96xf32> to vector<1x42xf32>
    %c1_137 = arith.constant 1 : index
    %c1176_138 = arith.constant 1176 : index
    %190 = vector.load %arg12[%c1_137, %c1176_138] : memref<2x1344xf32, #tpu.memory_space<vmem>>, vector<1x42xf32>
    tpu.vector_store %arg12[%c1_137, %c1176_138], %189 {strides = array<i32>} : memref<2x1344xf32, #tpu.memory_space<vmem>>, vector<1x42xf32>,
    %191 = vector.extract_strided_slice %68 {offsets = [29, 50], sizes = [1, 42], strides = [1, 1]} : vector<32x96xf32> to vector<1x42xf32>
    %c1_139 = arith.constant 1 : index
    %c1218_140 = arith.constant 1218 : index
    %192 = vector.load %arg12[%c1_139, %c1218_140] : memref<2x1344xf32, #tpu.memory_space<vmem>>, vector<1x42xf32>
    tpu.vector_store %arg12[%c1_139, %c1218_140], %191 {strides = array<i32>} : memref<2x1344xf32, #tpu.memory_space<vmem>>, vector<1x42xf32>,
    %193 = vector.extract_strided_slice %68 {offsets = [30, 50], sizes = [1, 42], strides = [1, 1]} : vector<32x96xf32> to vector<1x42xf32>
    %c1_141 = arith.constant 1 : index
    %c1260_142 = arith.constant 1260 : index
    %194 = vector.load %arg12[%c1_141, %c1260_142] : memref<2x1344xf32, #tpu.memory_space<vmem>>, vector<1x42xf32>
    tpu.vector_store %arg12[%c1_141, %c1260_142], %193 {strides = array<i32>} : memref<2x1344xf32, #tpu.memory_space<vmem>>, vector<1x42xf32>,
    %195 = vector.extract_strided_slice %68 {offsets = [31, 50], sizes = [1, 42], strides = [1, 1]} : vector<32x96xf32> to vector<1x42xf32>
    %c1_143 = arith.constant 1 : index
    %c1302_144 = arith.constant 1302 : index
    %196 = vector.load %arg12[%c1_143, %c1302_144] : memref<2x1344xf32, #tpu.memory_space<vmem>>, vector<1x42xf32>
    tpu.vector_store %arg12[%c1_143, %c1302_144], %195 {strides = array<i32>} : memref<2x1344xf32, #tpu.memory_space<vmem>>, vector<1x42xf32>,
    %c0_145 = arith.constant 0 : index
    %c0_146 = arith.constant 0 : index
    %197 = vector.load %arg12[%c0_145, %c0_146] : memref<2x1344xf32, #tpu.memory_space<vmem>>, vector<2x1344xf32>
    %c0_147 = arith.constant 0 : index
    %c0_148 = arith.constant 0 : index
    %198 = vector.load %arg7[%c0_147, %c0_148] : memref<1344x32xf32, #tpu.memory_space<vmem>>, vector<1344x32xf32>
    %cst_149 = arith.constant dense<0.000000e+00> : vector<2x32xf32>
    %199 = tpu.matmul %197, %198, %cst_149 {dimension_numbers = #tpu.dot_dimension_numbers<[1], [0], [0], [1], [0, 0, 1, 1], [], []>} : vector<2x1344xf32>, vector<1344x32xf32>, vector<2x32xf32> -> vector<2x32xf32>
    %c0_150 = arith.constant 0 : index
    %c0_151 = arith.constant 0 : index
    %200 = vector.load %arg8[%c0_150, %c0_151] : memref<1x32xf32, #tpu.memory_space<vmem>>, vector<1x32xf32>
    %201 = vector.broadcast %200 : vector<1x32xf32> to vector<2x32xf32>
    %202 = arith.addf %199, %201 : vector<2x32xf32>
    %cst_152 = arith.constant 0.000000e+00 : f32
    %203 = vector.broadcast %cst_152 : f32 to vector<2x32xf32>
    %204 = arith.maximumf %202, %203 : vector<2x32xf32>
    %c0_153 = arith.constant 0 : index
    %c0_154 = arith.constant 0 : index
    %205 = vector.load %arg9[%c0_153, %c0_154] : memref<32x2xf32, #tpu.memory_space<vmem>>, vector<32x2xf32>
    %cst_155 = arith.constant dense<0.000000e+00> : vector<2x2xf32>
    %206 = tpu.matmul %204, %205, %cst_155 {dimension_numbers = #tpu.dot_dimension_numbers<[1], [0], [0], [1], [0, 0, 1, 1], [], []>} : vector<2x32xf32>, vector<32x2xf32>, vector<2x2xf32> -> vector<2x2xf32>
    %c0_156 = arith.constant 0 : index
    %c0_157 = arith.constant 0 : index
    %207 = vector.load %arg10[%c0_156, %c0_157] : memref<1x2xf32, #tpu.memory_space<vmem>>, vector<1x2xf32>
    %208 = vector.broadcast %207 : vector<1x2xf32> to vector<2x2xf32>
    %209 = arith.addf %206, %208 : vector<2x2xf32>
    %210 = arith.negf %209 : vector<2x2xf32>
    %211 = math.exp %210 : vector<2x2xf32>
    %cst_158 = arith.constant 1.000000e+00 : f32
    %212 = vector.broadcast %cst_158 : f32 to vector<2x2xf32>
    %213 = arith.addf %212, %211 : vector<2x2xf32>
    %214 = arith.divf %212, %213 : vector<2x2xf32>
    %c0_159 = arith.constant 0 : index
    %c0_160 = arith.constant 0 : index
    %215 = vector.load %arg11[%c0_159, %c0_160] : memref<2x2xf32, #tpu.memory_space<vmem>>, vector<2x2xf32>
    tpu.vector_store %arg11[%c0_159, %c0_160], %214 {strides = array<i32>} : memref<2x2xf32, #tpu.memory_space<vmem>>, vector<2x2xf32>,
    return
  }
}

</mosaic_0001>

<bundles_post_ra>
// kernel: shallow_cnn_forward.1
= control target key start
LH: loop header
LB: loop body
LE: loop exit
PB: predicated region body
PF: predicated region fallthrough
CT: control target
= control target key end

     0   :  { %s4439_s0 = inlined_call_operand.vmem [shape: f32[28,104], index: 0, kind: input, shape index: {}]   ;;  %s4440_s1 = inlined_call_operand.vmem [shape: f32[5,16,28], index: 1, kind: input, shape index: {}]   ;;  %s4441_s2 = inlined_call_operand.vmem [shape: f32[16,1], index: 2, kind: input, shape index: {}]   ;;  %s4442_s3 = inlined_call_operand.vmem [shape: f32[16,1], index: 3, kind: input, shape index: {}]   ;;  %s4443_s4 = inlined_call_operand.vmem [shape: f32[5,32,16], index: 4, kind: input, shape index: {}]   ;;  %s4444_s5 = inlined_call_operand.vmem [shape: f32[32,1], index: 5, kind: input, shape index: {}]   ;;  %s4445_s6 = inlined_call_operand.vmem [shape: f32[32,1], index: 6, kind: input, shape index: {}]   ;;  %s4446_s7 = inlined_call_operand.vmem [shape: f32[1344,32], index: 7, kind: input, shape index: {}]   ;;  %s4447_s8 = inlined_call_operand.vmem [shape: f32[1,32], index: 8, kind: input, shape index: {}]   ;;  %s4448_s9 = inlined_call_operand.vmem [shape: f32[32,2], index: 9, kind: input, shape index: {}]   ;;  %s4449_s10 = inlined_call_operand.vmem [shape: f32[1,2], index: 10, kind: input, shape index: {}]   ;;  %s4450_s11 = inlined_call_operand.hbm [shape: f32[2,2], index: 11, kind: output, shape index: {}]  }
   0x1   :  { %v39_v0 = vld [vmem:[%s4439_s0] sm:$0xff]  ;;  %v40_v1 = vld [vmem:[%s4439_s0 + $0x8] sm:$0xff]  ;;  %v41_v2 = vld [vmem:[%s4439_s0 + $0x10] sm:$0xff] }
   0x2   :  { %v3177_v3 = vpack.i.bf16 %v40_v1, %v39_v0  ;;  %v42_v4 = vld [vmem:[%s4439_s0 + $0x18] sm:$0xf]  ;;  %v2406_v5 = vld [vmem:[%s4440_s1 + $0x10] sm:$0xff] }
   0x3   :  { %v3182_v6 = vpack.i.bf16 %v42_v4, %v41_v2 }
   0x4   :  { %16 = vsyncpa [#allocation4], 0  ;;  %s3270_s27 = smov 127   ;;  %s3271_s28 = smov 126   ;;  %vm63_vm0 = vcmask 228352   ;;  %v2864_v7 = vpack.c.bf16 %v40_v1, %v39_v0  ;;  %v2868_v8 = vpack.c.bf16 %v42_v4, %v41_v2  ;;  %v529_v9 = vld [vmem:[%s4441_s2 + $0x8] sm:$0xff] }
   0x5   :  { %3178 = vrot.lane.b32.xlu0 %v3177_v3, %s3270_s27  ;;  %3188 = vrot.lane.b32.xlu1 %v3177_v3, %s3271_s28  ;;  %s3272_s0 = smov 125   ;;  %s3273_s29 = smov 124   ;;  %v528_v10 = vld [vmem:[%s4441_s2] sm:$0xff]  ;;  %v3274_v11 = vmov 0   ;;  %v543_v13 = vld [vmem:[%s4442_s3 + $0x8] sm:$0xff]  ;;  %vm70_vm1 = vcmask 1043456  }
   0x6   :  { %2727 = vmatprep.mubr.msk.f32.mxu0 %vm63_vm0, %v2406_v5  ;;  %3218 = vset.pattern.permute.xlu1 %v3274_v11  ;;  %v542_v12 = vld [vmem:[%s4442_s3] sm:$0xff]  ;;  %vm3275_vm2 = vmmov 1   ;;  %v2407_v24 = vld [vmem:[%s4440_s1 + $0x18] sm:$0xff]  ;;  %v44_v33 = vld [vmem:[%s4440_s1 + $0x8] sm:$0xff]  ;;  %vm575_vm4 = vcmask 130048   ;;  %vm1166_vm5 = vcmask 335872  }
   0x7   :  { %3217 = vset.pattern.permute.xlu0 %v3274_v11  ;;  %vm3417_vm3 = vmpackc.low %vm70_vm1, %vm3275_vm2  ;;  %v43_v27 = vld [vmem:[%s4440_s1] sm:$0xff]  ;;  %v2415_v43 = vld [vmem:[%s4440_s1 + $0x28] sm:$0xff]  ;;  %s3279_s25 = smov 70   ;;  %s3280_s26 = smov 78   ;;  %vm1181_vm6 = vcmask 680272   ;;  %vm1187_vm7 = vcmask 1024672  }
   0x8   :  { %v2414_v37 = vld [vmem:[%s4440_s1 + $0x20] sm:$0xff]  ;;  %v2419_v47 = vld [vmem:[%s4440_s1 + $0x30] sm:$0xff]  ;;  %v2420_v52 = vld [vmem:[%s4440_s1 + $0x38] sm:$0xff]  ;;  %s3281_s30 = smov 114   ;;  %s3282_s12 = smov 120   ;;  %vm1197_vm8 = vcmask 1041392  }
   0x9   :  { %3183 = vrot.lane.b32.xlu0 %v3182_v6, %s3270_s27  ;;  %3193 = vrot.lane.b32.xlu1 %v3182_v6, %s3271_s28  ;;  %v2424_v54 = vld [vmem:[%s4440_s1 + $0x40] sm:$0xff]  ;;  %v2425_v55 = vld [vmem:[%s4440_s1 + $0x48] sm:$0xff]  ;;  %s3283_s13 = smov 36   ;;  %s3284_s14 = smov 34   ;;  %vm1198_vm9 = vcmask 321538   ;;  %vm1194_vm10 = vcmask 1031168  }
   0xa   :  { %v2429_v1 = vld [vmem:[%s4443_s4 + $0x20] sm:$0xff]  ;;  %v1136_v11 = vld [vmem:[%s4445_s6 + $0x10] sm:$0xff]  ;;  %s3285_s15 = smov 118   ;;  %s3286_s16 = smov 84   ;;  %vm3912_vm11 = vmor %vm1198_vm9, %vm1197_vm8  ;;  %vm1228_vm12 = vcmask 1041376   ;;  %vm1229_vm13 = vcmask 305154  }
   0xb   :  { %2778 = vmatprep.mubr.msk.f32.mxu1 %vm575_vm4, %v2429_v1  ;;  %s3287_s17 = smov 72   ;;  %s3289_s18 = smov 26   ;;  %vm1212_vm14 = vcmask 663872   ;;  %vm1225_vm15 = vcmask 1014784   ;;  %vm1492_vm1 = vcmask 621568   ;;  %vm3918_vm2 = vmor %vm1229_vm13, %vm1228_vm12  ;;  %vm1250_vm8 = vcmask 991872  }
   0xc   :  { %s3291_s2 = smov 76   ;;  %s3292_s3 = smov 74   ;;  %vm1268_vm12 = vcmask 631072   ;;  %vm1288_vm13 = vcmask 982016  }
   0xd   :  { %3198 = vrot.lane.b32.xlu0 %v3177_v3, %s3272_s0  ;;  %3203 = vrot.lane.b32.xlu1 %v3182_v6, %s3272_s0  ;;  %s3293_s1 = smov 42   ;;  %s3297_s19 = smov 32  }
   0xe   :  { %s3300_s20 = smov 116   ;;  %s3301_s21 = smov 66  }
   0xf   :  { %s3316_s22 = smov 100  }
  0x11   :  { %3208 = vrot.lane.b32.xlu0 %v3177_v3, %s3273_s29  ;;  %3213 = vrot.lane.b32.xlu1 %v3182_v6, %s3273_s29 }
  0x15   :  { %537 = vperm.xlu1 %3218, %v529_v9   ;;  %532 = vperm.xlu0 %3217, %v528_v10   ;;  %v1135_v9 = vld [vmem:[%s4445_s6 + $0x8] sm:$0xff] }
  0x16   :  { %v1107_v10 = vld [vmem:[%s4444_s5 + $0x8] sm:$0xff] }
  0x19   :  { %546 = vperm.xlu1 %3218, %v542_v12   ;;  %551 = vperm.xlu0 %3217, %v543_v13   ;;  %v1108_v12 = vld [vmem:[%s4444_s5 + $0x10] sm:$0xff]  ;;  %v1137_v13 = vld [vmem:[%s4445_s6 + $0x18] sm:$0xff] }
  0x77   :  { %v3179_v14 = vpop.permute.xlu0 %3178  ;;  %v3189_v22 = vpop.permute.xlu1 %3188 }
  0x78   :  { %v3181_v15 = vunpack.i.h.bf16 %v3179_v14  ;;  %v3180_v16 = vunpack.i.l.bf16 %v3179_v14  ;;  %v3191_v25 = vunpack.i.h.bf16 %v3189_v22  ;;  %v3190_v26 = vunpack.i.l.bf16 %v3189_v22  ;;  %v1109_v14 = vld [vmem:[%s4444_s5 + $0x18] sm:$0xff]  ;;  %v2430_v22 = vld [vmem:[%s4443_s4 + $0x28] sm:$0xff] }
  0x7a   :  { %v2854_v17 = vpack.c.bf16 %v3181_v15, %v3180_v16  ;;  %v2874_v29 = vpack.c.bf16 %v3191_v25, %v3190_v26  ;;  %v2432_v26 = vld [vmem:[%s4443_s4 + $0x38] sm:$0xff] }
  0x7b   :  { %v3184_v18 = vpop.permute.xlu0 %3183  ;;  %v3194_v28 = vpop.permute.xlu1 %3193 }
  0x7c   :  { %v3186_v19 = vunpack.i.h.bf16 %v3184_v18  ;;  %v3185_v20 = vunpack.i.l.bf16 %v3184_v18  ;;  %2855 = vmatprep.subr.bf16.mxu0 %v2854_v17  ;;  %v3196_v30 = vunpack.i.h.bf16 %v3194_v28  ;;  %v3195_v31 = vunpack.i.l.bf16 %v3194_v28 }
  0x7d   :  { %2857 = vmatpush3.bf16.msra.mxu0 %v2854_v17 }
  0x7e   :  { %v2858_v23 = vpack.c.bf16 %v3186_v19, %v3185_v20  ;;  %v2878_v34 = vpack.c.bf16 %v3196_v30, %v3195_v31  ;;  %v559_v30 = vld [vmem:[%s4443_s4 + $0x8] sm:$0xff]  ;;  %v560_v31 = vld [vmem:[%s4443_s4 + $0x10] sm:$0xff] }
  0x7f   :  { %v3199_v32 = vpop.permute.xlu0 %3198  ;;  %v3204_v38 = vpop.permute.xlu1 %3203 }
  0x80   :  { %2860 = vmatprep.subr.msk.bf16.mxu0 %vm3417_vm3, %v2858_v23  ;;  %v3201_v35 = vunpack.i.h.bf16 %v3199_v32  ;;  %v3200_v36 = vunpack.i.l.bf16 %v3199_v32  ;;  %v3206_v40 = vunpack.i.h.bf16 %v3204_v38  ;;  %v3205_v41 = vunpack.i.l.bf16 %v3204_v38  ;;  %v2442_v38 = vld [vmem:[%s4443_s4 + $0x48] sm:$0xff] }
  0x81   :  { %2863 = vmatpush3.bf16.msk.msra.mxu0 %vm3417_vm3, %v2858_v23  ;;  %v2431_v23 = vld [vmem:[%s4443_s4 + $0x30] sm:$0xff] }
  0x82   :  { %2865 = vmatprep.subr.bf16.mxu0 %v2864_v7  ;;  %v2884_v39 = vpack.c.bf16 %v3201_v35, %v3200_v36  ;;  %v2888_v44 = vpack.c.bf16 %v3206_v40, %v3205_v41  ;;  %v2441_v35 = vld [vmem:[%s4443_s4 + $0x40] sm:$0xff]  ;;  %v2444_v41 = vld [vmem:[%s4443_s4 + $0x58] sm:$0xff] }
  0x83   :  { %v3209_v42 = vpop.permute.xlu0 %3208  ;;  %v3214_v48 = vpop.permute.xlu1 %3213 }
  0x84   :  { %2728 = vmatmul.mubr.msk.f32.vlgmr.msra.gmra.mrb[0].mxu0 %vm63_vm0, %v2407_v24  ;;  %v3211_v45 = vunpack.i.h.bf16 %v3209_v42  ;;  %v3210_v46 = vunpack.i.l.bf16 %v3209_v42  ;;  %v3216_v50 = vunpack.i.h.bf16 %v3214_v48  ;;  %v3215_v51 = vunpack.i.l.bf16 %v3214_v48  ;;  %v2449_v42 = vld [vmem:[%s4443_s4 + $0x60] sm:$0xff]  ;;  %v2459_v48 = vld [vmem:[%s4443_s4 + $0x90] sm:$0xff] }
  0x85   :  { %2867 = vmatpush3.bf16.msra.mxu0 %v2864_v7  ;;  %2738 = vmatprep.mubr.msk.f32.mxu0 %vm63_vm0, %v43_v27  ;;  %v1134_v7 = vld [vmem:[%s4445_s6] sm:$0xff]  ;;  %s3288_s6 = smov 40  }
  0x86   :  { %2870 = vmatprep.subr.msk.bf16.mxu0 %vm3417_vm3, %v2868_v8  ;;  %v2894_v49 = vpack.c.bf16 %v3211_v45, %v3210_v46  ;;  %v2898_v53 = vpack.c.bf16 %v3216_v50, %v3215_v51  ;;  %v558_v27 = vld [vmem:[%s4443_s4] sm:$0xff]  ;;  %v2452_v45 = vld [vmem:[%s4443_s4 + $0x78] sm:$0xff]  ;;  %v3276_v51 = vmov 1983009808  }
  0x87   :  { %v2457_v46 = vld [vmem:[%s4443_s4 + $0x80] sm:$0xff] }
  0x89   :  { %2873 = vmatpush3.bf16.msk.msra.mxu0 %vm3417_vm3, %v2868_v8  ;;  %v1106_v8 = vld [vmem:[%s4444_s5] sm:$0xff]  ;;  %s3290_s5 = smov 122  }
  0x8a   :  { %2875 = vmatprep.subr.bf16.mxu0 %v2874_v29 }
  0x8c   :  { %2739 = vmatmul.mubr.msk.f32.vlgmr.msra.gmra.mrb[0].mxu0 %vm63_vm0, %v44_v33 }
  0x8d   :  { %2877 = vmatpush3.bf16.msra.mxu0 %v2874_v29  ;;  %2749 = vmatprep.mubr.msk.f32.mxu0 %vm63_vm0, %v2414_v37 }
  0x8e   :  { %2880 = vmatprep.subr.msk.bf16.mxu0 %vm3417_vm3, %v2878_v34 }
  0x91   :  { %2883 = vmatpush3.bf16.msk.msra.mxu0 %vm3417_vm3, %v2878_v34  ;;  %v561_v34 = vld [vmem:[%s4443_s4 + $0x18] sm:$0xff] }
  0x92   :  { %2885 = vmatprep.subr.bf16.mxu0 %v2884_v39 }
  0x94   :  { %2750 = vmatmul.mubr.msk.f32.vlgmr.msra.gmra.mrb[0].mxu0 %vm63_vm0, %v2415_v43  ;;  %v533_v56 = vpop.permute.xlu0 %532  ;;  %v538_v57 = vpop.permute.xlu1 %537  ;;  %v2450_v43 = vld [vmem:[%s4443_s4 + $0x68] sm:$0xff] }
  0x95   :  { %2887 = vmatpush3.bf16.msra.mxu0 %v2884_v39  ;;  %2760 = vmatprep.mubr.msk.f32.mxu0 %vm63_vm0, %v2419_v47  ;;  %v2443_v39 = vld [vmem:[%s4443_s4 + $0x50] sm:$0xff]  ;;  %v2458_v47 = vld [vmem:[%s4443_s4 + $0x88] sm:$0xff] }
  0x96   :  { %2890 = vmatprep.subr.msk.bf16.mxu0 %vm3417_vm3, %v2888_v44 }
  0x98   :  { %v552_v61 = vpop.permute.xlu0 %551  ;;  %v547_v63 = vpop.permute.xlu1 %546 }
  0x99   :  { %2893 = vmatpush3.bf16.msk.msra.mxu0 %vm3417_vm3, %v2888_v44  ;;  %v2451_v44 = vld [vmem:[%s4443_s4 + $0x70] sm:$0xff] }
  0x9a   :  { %2895 = vmatprep.subr.bf16.mxu0 %v2894_v49 }
  0x9c   :  { %2761 = vmatmul.mubr.msk.f32.vlgmr.msra.gmra.mrb[0].mxu0 %vm63_vm0, %v2420_v52  ;;  %v1170_v52 = vunpack.c.l.s4 %v3276_v51  ;;  %v1659_v51 = vld [vmem:[%s4446_s7 + $0xa8] sm:$0xff] }
  0x9d   :  { %2897 = vmatpush3.bf16.msra.mxu0 %v2894_v49  ;;  %2771 = vmatprep.mubr.msk.f32.mxu0 %vm63_vm0, %v2424_v54  ;;  %v2460_v49 = vld [vmem:[%s4443_s4 + $0x98] sm:$0xff]  ;;  %s3277_s4 = smov 30  }
  0x9e   :  { %2900 = vmatprep.subr.msk.bf16.mxu0 %vm3417_vm3, %v2898_v53 }
  0xa1   :  { %2903 = vmatpush3.bf16.msk.msra.mxu0 %vm3417_vm3, %v2898_v53  ;;  %v1172_v53 = vlaneseq  ;;  %vm1507_vm3 = vcmask 605184  }
  0xa4   :  { %2772 = vmatmul.mubr.msk.f32.vlgmr.msra.gmra.mrb[0].mxu0 %vm63_vm0, %v2425_v55  ;;  %v1171_v55 = vunpack.c.0.s8 %v1170_v52  ;;  %v1672_v52 = vld [vmem:[%s4446_s7 + $0x110] sm:$0xff]  ;;  %vm1219_vm0 = vcmask 1008272  }
 0x177   :  { %v2773_v58 = vpop.f32.mrb[0].mxu0 }
 0x178   :  { %v541_v59 = vmul.f32 %v2773_v58, %v538_v57  ;;  %v517_v60 = vpop.f32.mrb[1].mxu0 }
 0x179   :  { %v540_v62 = vmul.f32 %v533_v56, %v517_v60  ;;  %v1173_v56 = vshrl.u32 %v1172_v53, 7  ;;  %v1673_v53 = vld [vmem:[%s4446_s7 + $0x118] sm:$0xff] }
 0x17a   :  { %v555_v0 = vadd.f32 %v552_v61, %v541_v59 }
 0x17b   :  { %v554_v2 = vadd.f32 %v547_v63, %v540_v62 }
 0x17c   :  { %v557_v3 = vmax.f32 %v555_v0, 0.0  ;;  %v3585_v0 = vsub.s32 %v1171_v55, %v1173_v56  ;;  %v2962_v55 = vpack.c.bf16 %v1673_v53, %v1672_v52  ;;  %v1642_v56 = vld [vmem:[%s4446_s7 + $0x20] sm:$0xff]  ;;  %v1681_v52 = vld [vmem:[%s4446_s7 + $0x158] sm:$0xff] }
 0x17d   :  { %v556_v4 = vmax.f32 %v554_v2, 0.0  ;;  %v1650_v53 = vld [vmem:[%s4446_s7 + $0x60] sm:$0xff] }
 0x17f   :  { %v3224_v5 = vpack.i.bf16 %v557_v3, %v556_v4  ;;  %v2908_v6 = vpack.c.bf16 %v557_v3, %v556_v4 }
 0x181   :  { %3225 = vrot.lane.b32.xlu0 %v3224_v5, %s3271_s28  ;;  %3220 = vrot.lane.b32.xlu1 %v3224_v5, %s3270_s27 }
 0x185   :  { %3235 = vrot.lane.b32.xlu0 %v3224_v5, %s3273_s29  ;;  %3230 = vrot.lane.b32.xlu1 %v3224_v5, %s3272_s0  ;;  %s3278_s0 = smov 80  }
 0x189   :  { %1140 = vperm.xlu0 %3217, %v1134_v7   ;;  %1112 = vperm.xlu1 %3218, %v1106_v8  }
 0x18d   :  { %1145 = vperm.xlu0 %3217, %v1135_v9   ;;  %1117 = vperm.xlu1 %3218, %v1107_v10  }
 0x191   :  { %1150 = vperm.xlu0 %3217, %v1136_v11   ;;  %1122 = vperm.xlu1 %3218, %v1108_v12  }
 0x195   :  { %1155 = vperm.xlu0 %3217, %v1137_v13   ;;  %1127 = vperm.xlu1 %3218, %v1109_v14  }
 0x1f3   :  { %v3221_v15 = vpop.permute.xlu1 %3220  ;;  %v3226_v18 = vpop.permute.xlu0 %3225 }
 0x1f4   :  { %v3223_v16 = vunpack.i.h.bf16 %v3221_v15  ;;  %v3222_v17 = vunpack.i.l.bf16 %v3221_v15  ;;  %v3228_v20 = vunpack.i.h.bf16 %v3226_v18  ;;  %v3227_v21 = vunpack.i.l.bf16 %v3226_v18 }
 0x1f6   :  { %v2904_v19 = vpack.c.bf16 %v3223_v16, %v3222_v17  ;;  %v2912_v24 = vpack.c.bf16 %v3228_v20, %v3227_v21 }
 0x1f7   :  { %v3231_v25 = vpop.permute.xlu1 %3230  ;;  %v3236_v33 = vpop.permute.xlu0 %3235 }
 0x1f8   :  { %2905 = vmatprep.subr.bf16.mxu1 %v2904_v19  ;;  %v3233_v28 = vunpack.i.h.bf16 %v3231_v25  ;;  %v3232_v29 = vunpack.i.l.bf16 %v3231_v25  ;;  %v3238_v36 = vunpack.i.h.bf16 %v3236_v33  ;;  %v3237_v37 = vunpack.i.l.bf16 %v3236_v33  ;;  %v1638_v25 = vld [vmem:[%s4446_s7] sm:$0xff] }
 0x1f9   :  { %2907 = vmatpush3.bf16.msra.mxu1 %v2904_v19 }
 0x1fa   :  { %2909 = vmatprep.subr.bf16.mxu1 %v2908_v6  ;;  %v2916_v32 = vpack.c.bf16 %v3233_v28, %v3232_v29  ;;  %v2920_v40 = vpack.c.bf16 %v3238_v36, %v3237_v37  ;;  %v1686_v29 = vld [vmem:[%s4446_s7 + $0x180] sm:$0xff] }
 0x1fb   :  { %v1670_v36 = vld [vmem:[%s4446_s7 + $0x100] sm:$0xff] }
 0x1fc   :  { %2779 = vmatmul.mubr.msk.f32.vlgmr.msra.gmra.mrb[0].mxu1 %vm575_vm4, %v2430_v22 }
 0x1fd   :  { %2911 = vmatpush3.bf16.msra.mxu1 %v2908_v6  ;;  %2781 = vmatprep.mubr.msk.f32.mxu1 %vm575_vm4, %v2431_v23  ;;  %v1654_v23 = vld [vmem:[%s4446_s7 + $0x80] sm:$0xff] }
 0x1fe   :  { %2913 = vmatprep.subr.bf16.mxu1 %v2912_v24 }
 0x200   :  { %2782 = vmatmul.mubr.msk.f32.gmra.mrb[2].mxu1 %vm575_vm4, %v2432_v26 }
 0x201   :  { %2788 = vmatprep.mubr.msk.f32.mxu1 %vm575_vm4, %v558_v27  ;;  %v1639_v27 = vld [vmem:[%s4446_s7 + $0x8] sm:$0xff] }
 0x202   :  { %v2926_v28 = vpack.c.bf16 %v1639_v27, %v1638_v25  ;;  %v1647_v25 = vld [vmem:[%s4446_s7 + $0x48] sm:$0xff] }
 0x204   :  { %2789 = vmatmul.mubr.msk.f32.vlgmr.msra.gmra.mrb[0].mxu1 %vm575_vm4, %v559_v30  ;;  %v1687_v30 = vld [vmem:[%s4446_s7 + $0x188] sm:$0xff] }
 0x205   :  { %2915 = vmatpush3.bf16.msra.mxu1 %v2912_v24  ;;  %2791 = vmatprep.mubr.msk.f32.mxu1 %vm575_vm4, %v560_v31  ;;  %v1655_v24 = vld [vmem:[%s4446_s7 + $0x88] sm:$0xff]  ;;  %v2956_v33 = vpack.c.bf16 %v1687_v30, %v1686_v29 }
 0x206   :  { %2917 = vmatprep.subr.bf16.mxu1 %v2916_v32  ;;  %v2924_v26 = vpack.c.bf16 %v1655_v24, %v1654_v23  ;;  %v1646_v24 = vld [vmem:[%s4446_s7 + $0x40] sm:$0xff]  ;;  %v1695_v29 = vld [vmem:[%s4446_s7 + $0x1c8] sm:$0xff] }
 0x207   :  { %2957 = vmatprep.subr.bf16.mxu0 %v2956_v33  ;;  %v2942_v27 = vpack.c.bf16 %v1647_v25, %v1646_v24  ;;  %v1664_v33 = vld [vmem:[%s4446_s7 + $0xd0] sm:$0xff] }
 0x208   :  { %2792 = vmatmul.mubr.msk.f32.gmra.mrb[2].mxu1 %vm575_vm4, %v561_v34  ;;  %v1113_v50 = vpop.permute.xlu1 %1112  ;;  %v1141_v54 = vpop.permute.xlu0 %1140  ;;  %v1656_v34 = vld [vmem:[%s4446_s7 + $0x90] sm:$0xff] }
 0x209   :  { %2798 = vmatprep.mubr.msk.f32.mxu1 %vm575_vm4, %v2441_v35  ;;  %v1657_v35 = vld [vmem:[%s4446_s7 + $0x98] sm:$0xff] }
 0x20a   :  { %v2928_v37 = vpack.c.bf16 %v1657_v35, %v1656_v34  ;;  %v1665_v34 = vld [vmem:[%s4446_s7 + $0xd8] sm:$0xff] }
 0x20b   :  { %v2944_v35 = vpack.c.bf16 %v1665_v34, %v1664_v33 }
 0x20c   :  { %2799 = vmatmul.mubr.msk.f32.vlgmr.msra.gmra.mrb[0].mxu1 %vm575_vm4, %v2442_v38  ;;  %v1118_v57 = vpop.permute.xlu1 %1117  ;;  %v1146_v61 = vpop.permute.xlu0 %1145  ;;  %v1671_v38 = vld [vmem:[%s4446_s7 + $0x108] sm:$0xff] }
 0x20d   :  { %2919 = vmatpush3.bf16.msra.mxu1 %v2916_v32  ;;  %2801 = vmatprep.mubr.msk.f32.mxu1 %vm575_vm4, %v2443_v39  ;;  %v1640_v39 = vld [vmem:[%s4446_s7 + $0x10] sm:$0xff] }
 0x20e   :  { %2921 = vmatprep.subr.bf16.mxu1 %v2920_v40 }
 0x210   :  { %2802 = vmatmul.mubr.msk.f32.gmra.mrb[2].mxu1 %vm575_vm4, %v2444_v41  ;;  %v2958_v41 = vpack.c.bf16 %v1671_v38, %v1670_v36  ;;  %v1678_v36 = vld [vmem:[%s4446_s7 + $0x140] sm:$0xff]  ;;  %v1648_v38 = vld [vmem:[%s4446_s7 + $0x50] sm:$0xff] }
 0x211   :  { %2808 = vmatprep.mubr.msk.f32.mxu1 %vm575_vm4, %v2449_v42 }
 0x212   :  { %2959 = vmatpush3.bf16.msra.mxu0 %v2958_v41  ;;  %v1696_v41 = vld [vmem:[%s4446_s7 + $0x1d0] sm:$0xff] }
 0x214   :  { %2809 = vmatmul.mubr.msk.f32.vlgmr.msra.gmra.mrb[0].mxu1 %vm575_vm4, %v2450_v43  ;;  %v1123_v43 = vpop.permute.xlu1 %1122 }
 0x215   :  { %2923 = vmatpush3.bf16.msra.mxu1 %v2920_v40  ;;  %2811 = vmatprep.mubr.msk.f32.mxu1 %vm575_vm4, %v2451_v44  ;;  %v1641_v40 = vld [vmem:[%s4446_s7 + $0x18] sm:$0xff]  ;;  %v1688_v44 = vld [vmem:[%s4446_s7 + $0x190] sm:$0xff] }
 0x216   :  { %2925 = vmatprep.subr.bf16.mxu1 %v2924_v26  ;;  %v2930_v42 = vpack.c.bf16 %v1641_v40, %v1640_v39  ;;  %v1649_v40 = vld [vmem:[%s4446_s7 + $0x58] sm:$0xff] }
 0x218   :  { %2812 = vmatmul.mubr.msk.f32.gmra.mrb[2].mxu1 %vm575_vm4, %v2452_v45  ;;  %v1689_v45 = vld [vmem:[%s4446_s7 + $0x198] sm:$0xff] }
 0x219   :  { %2818 = vmatprep.mubr.msk.f32.mxu1 %vm575_vm4, %v2457_v46  ;;  %v1658_v46 = vld [vmem:[%s4446_s7 + $0xa0] sm:$0xff] }
 0x21c   :  { %2819 = vmatmul.mubr.msk.f32.vlgmr.msra.gmra.mrb[0].mxu1 %vm575_vm4, %v2458_v47 }
 0x21d   :  { %2821 = vmatprep.mubr.msk.f32.mxu1 %vm575_vm4, %v2459_v48  ;;  %2927 = vmatpush3.bf16.msra.mxu1 %v2926_v28  ;;  %v1694_v28 = vld [vmem:[%s4446_s7 + $0x1c0] sm:$0xff] }
 0x21e   :  { %2929 = vmatprep.subr.bf16.mxu1 %v2928_v37  ;;  %v1679_v37 = vld [vmem:[%s4446_s7 + $0x148] sm:$0xff] }
 0x21f   :  { %v2974_v39 = vpack.c.bf16 %v1679_v37, %v1678_v36 }
 0x220   :  { %2822 = vmatmul.mubr.msk.f32.gmra.mrb[2].mxu1 %vm575_vm4, %v2460_v49  ;;  %vm1260_vm4 = vcmask 1041360  }
 0x221   :  { %2931 = vmatpush3.bf16.msra.mxu1 %v2930_v42  ;;  %v1128_v42 = vpop.permute.xlu1 %1127 }
 0x2ef   :  { %v2820_v58 = vpop.f32.mrb[0].mxu1 }
 0x2f0   :  { %v1131_v59 = vmul.f32 %v2820_v58, %v1118_v57  ;;  %v1083_v60 = vpop.f32.mrb[1].mxu1  ;;  %v1643_v57 = vld [vmem:[%s4446_s7 + $0x28] sm:$0xff] }
 0x2f1   :  { %v1130_v62 = vmul.f32 %v1113_v50, %v1083_v60  ;;  %v2960_v50 = vpack.c.bf16 %v1689_v45, %v1688_v44  ;;  %v2934_v58 = vpack.c.bf16 %v1643_v57, %v1642_v56  ;;  %v1690_v60 = vld [vmem:[%s4446_s7 + $0x1a0] sm:$0xff]  ;;  %v1697_v44 = vld [vmem:[%s4446_s7 + $0x1d8] sm:$0xff] }
 0x2f2   :  { %v1159_v63 = vadd.f32 %v1146_v61, %v1131_v59  ;;  %v1151_v59 = vpop.permute.xlu0 %1150  ;;  %v1691_v61 = vld [vmem:[%s4446_s7 + $0x1a8] sm:$0xff]  ;;  %v1666_v45 = vld [vmem:[%s4446_s7 + $0xe0] sm:$0xff] }
 0x2f3   :  { %v1158_v1 = vadd.f32 %v1141_v54, %v1130_v62  ;;  %v3587_v2 = vpop.f32.mrb[2].mxu1  ;;  %v2932_v54 = vpack.c.bf16 %v1659_v51, %v1658_v46  ;;  %2961 = vmatprep.subr.bf16.mxu0 %v2960_v50  ;;  %v1667_v46 = vld [vmem:[%s4446_s7 + $0xe8] sm:$0xff]  ;;  %v1680_v51 = vld [vmem:[%s4446_s7 + $0x150] sm:$0xff]  ;;  %v1698_v57 = vld [vmem:[%s4446_s7 + $0x1e0] sm:$0xff] }
 0x2f4   :  { %v1163_v3 = vmax.f32 %v1159_v63, 0.0  ;;  %v3589_v4 = vpop.f32.mrb[3].mxu1  ;;  %2963 = vmatpush3.bf16.msra.mxu0 %v2962_v55  ;;  %v2948_v50 = vpack.c.bf16 %v1667_v46, %v1666_v45 }
 0x2f5   :  { %v1162_v5 = vmax.f32 %v1158_v1, 0.0  ;;  %v1132_v47 = vmul.f32 %v1123_v43, %v3589_v4  ;;  %2933 = vmatprep.subr.bf16.mxu1 %v2932_v54  ;;  %v1660_v4 = vld [vmem:[%s4446_s7 + $0xb0] sm:$0xff]  ;;  %v2946_v43 = vpack.c.bf16 %v1649_v40, %v1648_v38  ;;  %v1651_v54 = vld [vmem:[%s4446_s7 + $0x68] sm:$0xff] }
 0x2f6   :  { %v1246_v6 = vrot.slane %v1163_v3, %v3585_v0  ;;  %v1277_v7 = vcombine.high %v1163_v3, %v1163_v3  ;;  %2935 = vmatpush3.bf16.msra.mxu1 %v2934_v58  ;;  %v2964_v3 = vpack.c.bf16 %v1691_v61, %v1690_v60  ;;  %v2950_v55 = vpack.c.bf16 %v1651_v54, %v1650_v53  ;;  %v1156_v56 = vpop.permute.xlu0 %1155  ;;  %v1699_v58 = vld [vmem:[%s4446_s7 + $0x1e8] sm:$0xff] }
 0x2f7   :  { %1167 = vst.msk [vmem:[#allocation2] sm:$0x1] %vm1166_vm5, %v1162_v5  ;;  %v1175_v9 = vrot.slane %v1162_v5, %v3585_v0  ;;  %v1201_v11 = vcombine.high %v1162_v5, %v1162_v5  ;;  %v1160_v62 = vadd.f32 %v1151_v59, %v1132_v47  ;;  %v1661_v5 = vld [vmem:[%s4446_s7 + $0xb8] sm:$0xff]  ;;  %v1133_v47 = vmul.f32 %v3587_v2, %v1128_v42  ;;  %v1668_v59 = vld [vmem:[%s4446_s7 + $0xf0] sm:$0xff] }
 0x2f8   :  { %1515 = vrot.lane.b32.xlu1 %v1246_v6, %s3277_s4  ;;  %1247 = vrot.lane.b32.xlu0 %v1246_v6, %s3278_s0  ;;  %v1284_v8 = vrot.slane %v1277_v7, %v3585_v0  ;;  %v1264_v10 = vcombine.high %v1246_v6, %v1246_v6  ;;  %v1252_v14 = vrot.slane %v1246_v6, 7  ;;  %v2936_v6 = vpack.c.bf16 %v1661_v5, %v1660_v4  ;;  %v1674_v7 = vld [vmem:[%s4446_s7 + $0x120] sm:$0xff] }
 0x2f9   :  { %v3599_v12 = vcombine.high %v1175_v9, %v1175_v9  ;;  %v3604_v13 = vrot.slane %v1201_v11, %v3585_v0  ;;  %v1176_v17 = vrot.slane %v1175_v9, 7  ;;  %v1645_v11 = vld [vmem:[%s4446_s7 + $0x38] sm:$0xff]  ;;  %2965 = vmatprep.subr.bf16.mxu0 %v2964_v3  ;;  %v2978_v2 = vpack.c.bf16 %v1681_v52, %v1680_v51  ;;  %v1683_v3 = vld [vmem:[%s4446_s7 + $0x168] sm:$0xff] }
 0x2fa   :  { %v1253_v15 = vrot.slane %v1252_v14, 2  ;;  %v3611_v16 = vcombine.high %v1284_v8, %v1284_v8  ;;  %v1270_v20 = vrot.slane %v1264_v10, 7  ;;  %v1295_v22 = vrot.slane %v1284_v8, 7  ;;  %2937 = vmatprep.subr.bf16.mxu1 %v2936_v6  ;;  %v1693_v14 = vld [vmem:[%s4446_s7 + $0x1b8] sm:$0xff]  ;;  %v1652_v6 = vld [vmem:[%s4446_s7 + $0x70] sm:$0xff] }
 0x2fb   :  { %v1177_v18 = vrot.slane %v1176_v17, 2  ;;  %v3619_v19 = vcombine.high %v3604_v13, %v3604_v13  ;;  %v1189_v32 = vrot.slane %v3599_v12, 7  ;;  %v1214_v49 = vrot.slane %v3604_v13, 7 }
 0x2fc   :  { %1534 = vrot.lane.b32.xlu1 %v1284_v8, %s3279_s25  ;;  %1477 = vrot.lane.b32.xlu0 %v1175_v9, %s3280_s26  ;;  %v1271_v21 = vrot.slane %v1270_v20, 2  ;;  %v1296_v31 = vrot.slane %v1295_v22, 2  ;;  %v1308_v1 = vrot.slane %v3611_v16, 7  ;;  %v1644_v9 = vld [vmem:[%s4446_s7 + $0x30] sm:$0xff]  ;;  %v1662_v20 = vld [vmem:[%s4446_s7 + $0xc0] sm:$0xff]  ;;  %v1161_v60 = vadd.f32 %v1156_v56, %v1133_v47 }
 0x2fd   :  { %v1190_v48 = vrot.slane %v1189_v32, 2  ;;  %v1215_v63 = vrot.slane %v1214_v49, 2  ;;  %v1232_v17 = vrot.slane %v3619_v19, 7  ;;  %v1676_v22 = vld [vmem:[%s4446_s7 + $0x130] sm:$0xff]  ;;  %v2972_v32 = vpack.c.bf16 %v1695_v29, %v1694_v28 }
 0x2fe   :  { %v2976_v49 = vpack.c.bf16 %v1697_v44, %v1696_v41 }
 0x300   :  { %1526 = vrot.lane.b32.xlu1 %v1264_v10, %s3281_s30  ;;  %1285 = vrot.lane.b32.xlu0 %v1284_v8, %s3282_s12  ;;  %v1675_v8 = vld [vmem:[%s4446_s7 + $0x128] sm:$0xff] }
 0x304   :  { %1265 = vrot.lane.b32.xlu0 %v1264_v10, %s3283_s13  ;;  %1485 = vrot.lane.b32.xlu1 %v3599_v12, %s3284_s14  ;;  %v2966_v10 = vpack.c.bf16 %v1675_v8, %v1674_v7  ;;  %v1653_v7 = vld [vmem:[%s4446_s7 + $0x78] sm:$0xff] }
 0x305   :  { %v2954_v8 = vpack.c.bf16 %v1653_v7, %v1652_v6 }
 0x306   :  { %2967 = vmatpush3.bf16.msra.mxu0 %v2966_v10  ;;  %v1701_v10 = vld [vmem:[%s4446_s7 + $0x1f8] sm:$0xff] }
 0x308   :  { %1496 = vrot.lane.b32.xlu1 %v3604_v13, %s3285_s15  ;;  %1184 = vrot.lane.b32.xlu0 %v3599_v12, %s3286_s16  ;;  %v2938_v12 = vpack.c.bf16 %v1645_v11, %v1644_v9  ;;  %s3298_s16 = smov 68   ;;  %v1700_v9 = vld [vmem:[%s4446_s7 + $0x1f0] sm:$0xff] }
 0x309   :  { %v1684_v11 = vld [vmem:[%s4446_s7 + $0x170] sm:$0xff] }
 0x30a   :  { %2939 = vmatpush3.bf16.msra.mxu1 %v2938_v12  ;;  %v1165_v12 = vmax.f32 %v1161_v60, 0.0 }
 0x30c   :  { %1519 = vrot.lane.b32.xlu1 %v1253_v15, %s3287_s17  ;;  %1209 = vrot.lane.b32.xlu0 %v3604_v13, %s3288_s6  ;;  %s3295_s6 = smov 112   ;;  %v1692_v13 = vld [vmem:[%s4446_s7 + $0x1b0] sm:$0xff]  ;;  %v1439_v37 = vcombine.high %v1165_v12, %v1165_v12 }
 0x310   :  { %1545 = vrot.lane.b32.xlu1 %v3611_v16, %s3289_s18  ;;  %1254 = vrot.lane.b32.xlu0 %v1253_v15, %s3290_s5  ;;  %s3296_s5 = smov 82   ;;  %v3725_v15 = vmax.f32 %v1160_v62, 0.0  ;;  %v2980_v62 = vpack.c.bf16 %v1699_v58, %v1698_v57 }
 0x312   :  { %v3756_v30 = vrot.slane %v3725_v15, %v3585_v0  ;;  %v1358_v61 = vcombine.high %v3725_v15, %v3725_v15  ;;  %v1685_v15 = vld [vmem:[%s4446_s7 + $0x178] sm:$0xff] }
 0x314   :  { %1303 = vrot.lane.b32.xlu0 %v3611_v16, %s3291_s2  ;;  %1481 = vrot.lane.b32.xlu1 %v1177_v18, %s3282_s12  ;;  %s3294_s12 = smov 28   ;;  %v1309_v16 = vrot.slane %v1308_v1, 2  ;;  %v1682_v1 = vld [vmem:[%s4446_s7 + $0x160] sm:$0xff]  ;;  %v1333_v24 = vrot.slane %v3756_v30, 7 }
 0x315   :  { %v2982_v5 = vpack.c.bf16 %v1683_v3, %v1682_v1 }
 0x316   :  { %v1334_v25 = vrot.slane %v1333_v24, 2 }
 0x318   :  { %1504 = vrot.lane.b32.xlu1 %v3619_v19, %s3292_s3  ;;  %1178 = vrot.lane.b32.xlu0 %v1177_v18, %s3293_s1  ;;  %v2968_v18 = vpack.c.bf16 %v1693_v14, %v1692_v13  ;;  %v1365_v13 = vrot.slane %v1358_v61, %v3585_v0  ;;  %v2984_v14 = vpack.c.bf16 %v1701_v10, %v1700_v9 }
 0x31a   :  { %2969 = vmatprep.subr.bf16.mxu0 %v2968_v18  ;;  %v2986_v18 = vpack.c.bf16 %v1685_v15, %v1684_v11 }
 0x31c   :  { %1530 = vrot.lane.b32.xlu1 %v1271_v21, %s3294_s12  ;;  %1222 = vrot.lane.b32.xlu0 %v3619_v19, %s3273_s29  ;;  %v1677_v19 = vld [vmem:[%s4446_s7 + $0x138] sm:$0xff]  ;;  %s3302_s29 = smov 110  }
 0x31d   :  { %v2970_v26 = vpack.c.bf16 %v1677_v19, %v1676_v22  ;;  %v1751_v22 = vld [vmem:[%s4446_s7 + $0x388] sm:$0xff]  ;;  %v1403_v19 = vrot.slane %v1165_v12, %v3585_v0 }
 0x31f   :  { %2971 = vmatpush3.bf16.msra.mxu0 %v2970_v26  ;;  %v1383_v26 = vcombine.high %v1365_v13, %v1365_v13  ;;  %v1414_v36 = vrot.slane %v1403_v19, 7 }
 0x320   :  { %1541 = vrot.lane.b32.xlu1 %v1296_v31, %s3295_s6  ;;  %1272 = vrot.lane.b32.xlu0 %v1271_v21, %s3280_s26  ;;  %v1663_v21 = vld [vmem:[%s4446_s7 + $0xc8] sm:$0xff]  ;;  %s3313_s26 = smov 58  }
 0x321   :  { %v2940_v23 = vpack.c.bf16 %v1663_v21, %v1662_v20  ;;  %2973 = vmatprep.subr.bf16.mxu0 %v2972_v32  ;;  %v1750_v21 = vld [vmem:[%s4446_s7 + $0x380] sm:$0xff]  ;;  %v1421_v32 = vcombine.high %v1403_v19, %v1403_v19  ;;  %v1415_v38 = vrot.slane %v1414_v36, 2 }
 0x323   :  { %2941 = vmatprep.subr.bf16.mxu1 %v2940_v23  ;;  %2975 = vmatpush3.bf16.msra.mxu0 %v2974_v39  ;;  %v3020_v23 = vpack.c.bf16 %v1751_v22, %v1750_v21  ;;  %v1427_v34 = vrot.slane %v1421_v32, 7  ;;  %v1446_v39 = vrot.slane %v1439_v37, %v3585_v0 }
 0x324   :  { %1191 = vrot.lane.b32.xlu1 %v1190_v48, %s3271_s28  ;;  %1297 = vrot.lane.b32.xlu0 %v1296_v31, %s3284_s14  ;;  %v1233_v31 = vrot.slane %v1232_v17, 2  ;;  %v1719_v17 = vld [vmem:[%s4446_s7 + $0x288] sm:$0xff]  ;;  %s3306_s14 = smov 106  }
 0x325   :  { %2943 = vmatpush3.bf16.msra.mxu1 %v2942_v27  ;;  %2977 = vmatprep.subr.bf16.mxu0 %v2976_v49  ;;  %v1371_v27 = vrot.slane %v1365_v13, 7  ;;  %v1459_v40 = vcombine.high %v1446_v39, %v1446_v39  ;;  %v1452_v41 = vrot.slane %v1446_v39, 7 }
 0x326   :  { %2945 = vmatprep.subr.bf16.mxu1 %v2944_v35  ;;  %v1428_v35 = vrot.slane %v1427_v34, 2  ;;  %v1709_v34 = vld [vmem:[%s4446_s7 + $0x238] sm:$0xff] }
 0x327   :  { %2979 = vmatpush3.bf16.msra.mxu0 %v2978_v2  ;;  %v1372_v28 = vrot.slane %v1371_v27, 2  ;;  %v1453_v44 = vrot.slane %v1452_v41, 2  ;;  %v1470_v45 = vrot.slane %v1459_v40, 7 }
 0x328   :  { %1489 = vrot.lane.b32.xlu1 %v1190_v48, %s3291_s2  ;;  %1216 = vrot.lane.b32.xlu0 %v1215_v63, %s3296_s5  ;;  %s3299_s5 = smov 38   ;;  %v3792_v48 = vcombine.high %v3756_v30, %v3756_v30  ;;  %s3305_s2 = smov 24  }
 0x329   :  { %2947 = vmatpush3.bf16.msra.mxu1 %v2946_v43  ;;  %2981 = vmatprep.subr.bf16.mxu0 %v2980_v62 }
 0x32a   :  { %2949 = vmatprep.subr.bf16.mxu1 %v2948_v50  ;;  %v1351_v29 = vrot.slane %v3792_v48, 7 }
 0x32b   :  { %2983 = vmatpush3.bf16.msra.mxu0 %v2982_v5 }
 0x32c   :  { %1500 = vrot.lane.b32.xlu1 %v1215_v63, %s3297_s19  ;;  %1310 = vrot.lane.b32.xlu0 %v1309_v16, %s3285_s15  ;;  %v1669_v63 = vld [vmem:[%s4446_s7 + $0xf8] sm:$0xff]  ;;  %s3303_s15 = smov 22  }
 0x32d   :  { %2951 = vmatpush3.bf16.msra.mxu1 %v2950_v55  ;;  %v2952_v4 = vpack.c.bf16 %v1669_v63, %v1668_v59  ;;  %2985 = vmatprep.subr.bf16.mxu0 %v2984_v14 }
 0x32f   :  { %2953 = vmatprep.subr.bf16.mxu1 %v2952_v4  ;;  %2987 = vmatpush3.bf16.msra.mxu0 %v2986_v18 }
 0x330   :  { %1549 = vrot.lane.b32.xlu1 %v1309_v16, %s3298_s16  ;;  %1234 = vrot.lane.b32.xlu0 %v1233_v31, %s3299_s5  ;;  %v1718_v16 = vld [vmem:[%s4446_s7 + $0x280] sm:$0xff] }
 0x331   :  { %2955 = vmatpush3.bf16.msra.mxu1 %v2954_v8  ;;  %v2988_v20 = vpack.c.bf16 %v1719_v17, %v1718_v16  ;;  %3021 = vmatprep.subr.bf16.mxu0 %v3020_v23  ;;  %v1724_v23 = vld [vmem:[%s4446_s7 + $0x2b0] sm:$0xff] }
 0x333   :  { %2989 = vmatprep.subr.bf16.mxu1 %v2988_v20 }
 0x334   :  { %1511 = vrot.lane.b32.xlu1 %v1233_v31, %s3300_s20  ;;  %1341 = vrot.lane.b32.xlu0 %v3792_v48, %s3300_s20  ;;  %v1389_v31 = vrot.slane %v1383_v26, 7 }
 0x336   :  { %v1390_v33 = vrot.slane %v1389_v31, 2 }
 0x338   :  { %1564 = vrot.lane.b32.xlu1 %v3792_v48, %s3301_s21  ;;  %1328 = vrot.lane.b32.xlu0 %v3756_v30, %s3297_s19  ;;  %v1471_v48 = vrot.slane %v1470_v45, 2  ;;  %s3320_s19 = smov [#allocation3]  }
 0x339   :  { %s2398_s23 = sshll.u32 %s3320_s19, 4  ;;  %s2399_s23 = int_to_ptr.vmem [resolvable:$true] %s2398_s23 }
 0x33a   :  { %s3246_s24 = scalar_lea.vmem %s2399_s23, 32  ;;  %p3251_p1 = scmp.lt.s32.totalorder %s2399_s23, %s2399_s23 }
 0x33b   :  { %p3247_p0 = scmp.ne.s32.totalorder %s2399_s23, %s3246_s24  ;;  %p3252_p2 = scmp.lt.s32.totalorder %s3246_s24, %s3246_s24 }
 0x33c   :  { %1556 = vrot.lane.b32.xlu1 %v3756_v30, %s3302_s29  ;;  %1366 = vrot.lane.b32.xlu0 %v1365_v13, %s3287_s17  ;;  %s3304_s17 = smov 62   ;;  %v1352_v30 = vrot.slane %v1351_v29, 2 }
 0x33d   :  { %p3253_p3 = por %p3252_p2, %p3251_p1 }
 0x33f   :  { %p3254_p4 = pnand %p3253_p3, %p3247_p0 }
 0x340   :  { %1575 = vrot.lane.b32.xlu1 %v1365_v13, %s3303_s15  ;;  %1404 = vrot.lane.b32.xlu0 %v1403_v19, %s3295_s6  ;;  %s3307_s6 = smov 64  }
 0x344   :  { %1594 = vrot.lane.b32.xlu1 %v1403_v19, %s3304_s17  ;;  %1335 = vrot.lane.b32.xlu0 %v1334_v25, %s3292_s3  ;;  %s3308_s3 = smov 108  }
 0x348   :  { %1560 = vrot.lane.b32.xlu1 %v1334_v25, %s3305_s2  ;;  %1384 = vrot.lane.b32.xlu0 %v1383_v26, %s3294_s12  ;;  %s3309_s12 = smov 20  }
 0x34c   :  { %1586 = vrot.lane.b32.xlu1 %v1383_v26, %s3306_s14  ;;  %1373 = vrot.lane.b32.xlu0 %v1372_v28, %s3281_s30  ;;  %s3310_s30 = smov 60  }
 0x350   :  { %1579 = vrot.lane.b32.xlu1 %v1372_v28, %s3307_s6  ;;  %1353 = vrot.lane.b32.xlu0 %v1352_v30, %s3277_s4  ;;  %s3311_s4 = smov 104  }
 0x354   :  { %1571 = vrot.lane.b32.xlu1 %v1352_v30, %s3308_s3  ;;  %1391 = vrot.lane.b32.xlu0 %v1390_v33, %s3279_s25  ;;  %s3312_s25 = smov 18  }
 0x358   :  { %1590 = vrot.lane.b32.xlu1 %v1390_v33, %s3309_s12  ;;  %1429 = vrot.lane.b32.xlu0 %v1428_v35, %s3302_s29 }
 0x35c   :  { %1609 = vrot.lane.b32.xlu1 %v1428_v35, %s3310_s30  ;;  %1416 = vrot.lane.b32.xlu0 %v1415_v38, %s3289_s18  ;;  %s3314_s18 = smov 102  }
 0x360   :  { %1601 = vrot.lane.b32.xlu1 %v1415_v38, %s3311_s4  ;;  %1422 = vrot.lane.b32.xlu0 %v1421_v32, %s3298_s16  ;;  %s3315_s16 = smov 16  }
 0x364   :  { %1605 = vrot.lane.b32.xlu1 %v1421_v32, %s3312_s25  ;;  %1460 = vrot.lane.b32.xlu0 %v1459_v40, %s3308_s3 }
 0x368   :  { %1624 = vrot.lane.b32.xlu1 %v1459_v40, %s3313_s26  ;;  %1447 = vrot.lane.b32.xlu0 %v1446_v39, %s3305_s2 }
 0x36a   :  { %v3881_v42 = vpop.permute.xlu1 %1515  ;;  %v3883_v43 = vpop.permute.xlu0 %1247 }
 0x36c   :  { %1616 = vrot.lane.b32.xlu1 %v1446_v39, %s3314_s18  ;;  %1454 = vrot.lane.b32.xlu0 %v1453_v44, %s3301_s21 }
 0x36e   :  { %v3886_v46 = vpop.permute.xlu1 %1534  ;;  %v1478_v47 = vpop.permute.xlu0 %1477 }
 0x36f   :  { %1480 = vst.msk [vmem:[#allocation2 + $0x1] sm:$0x1] %vm1166_vm5, %v1478_v47  ;;  %vm1261_vm5 = vcmask 288770   ;;  %v1536_v31 = vrot.slane %v3886_v46, 6  ;;  %v1702_v47 = vld [vmem:[%s4446_s7 + $0x200] sm:$0xff] }
 0x370   :  { %1620 = vrot.lane.b32.xlu1 %v1453_v44, %s3315_s16  ;;  %1472 = vrot.lane.b32.xlu0 %v1471_v48, %s3303_s15  ;;  %vm3933_vm9 = vmor %vm1261_vm5, %vm1260_vm4  ;;  %vm1313_vm4 = vcmask 965632   ;;  %vm1306_vm5 = vcmask 959072  }
 0x372   :  { %v3890_v49 = vpop.permute.xlu1 %1526  ;;  %v3892_v50 = vpop.permute.xlu0 %1285 }
 0x373   :  { %v1287_v24 = vrot.slane %v3892_v50, 6 }
 0x374   :  { %1631 = vrot.lane.b32.xlu1 %v1471_v48, %s3316_s22  ;;  %v1703_v48 = vld [vmem:[%s4446_s7 + $0x208] sm:$0xff] }
 0x375   :  { %v1289_v32 = vsel %vm1288_vm13, %v1287_v24, %v3892_v50  ;;  %vm1338_vm13 = vcmask 942672  }
 0x376   :  { %v3894_v51 = vpop.permute.xlu0 %1265  ;;  %v1486_v52 = vpop.permute.xlu1 %1485 }
 0x37a   :  { %v1497_v53 = vpop.permute.xlu1 %1496  ;;  %v1185_v2 = vpop.permute.xlu0 %1184 }
 0x37e   :  { %v3896_v54 = vpop.permute.xlu1 %1519  ;;  %v1210_v55 = vpop.permute.xlu0 %1209 }
 0x37f   :  { %v1521_v25 = vrot.slane %v3896_v54, 6 }
 0x382   :  { %v3898_v56 = vpop.permute.xlu1 %1545  ;;  %v3900_v57 = vpop.permute.xlu0 %1254 }
 0x383   :  { %v1256_v20 = vrot.slane %v3900_v57, 6 }
 0x386   :  { %v3902_v58 = vpop.permute.xlu0 %1303  ;;  %v1482_v59 = vpop.permute.xlu1 %1481 }
 0x387   :  { %1484 = vst.msk [vmem:[#allocation2 + $0x1] sm:$0x1] %vm1181_vm6, %v1482_v59 }
 0x388   :  { %1488 = vst.msk [vmem:[#allocation2 + $0x1] sm:$0x1] %vm1187_vm7, %v1486_v52  ;;  %v1721_v52 = vld [vmem:[%s4446_s7 + $0x298] sm:$0xff] }
 0x38a   :  { %v1505_v60 = vpop.permute.xlu1 %1504  ;;  %v1179_v61 = vpop.permute.xlu0 %1178 }
 0x38b   :  { %1182 = vst.msk [vmem:[#allocation2] sm:$0x1] %vm1181_vm6, %v1179_v61  ;;  %v1506_v14 = vrot.slane %v1505_v60, 6  ;;  %vm1237_vm6 = vcmask 647472   ;;  %v1753_v61 = vld [vmem:[%s4446_s7 + $0x398] sm:$0xff] }
 0x38c   :  { %1188 = vst.msk [vmem:[#allocation2] sm:$0x1] %vm1187_vm7, %v1185_v2  ;;  %vm1257_vm7 = vcmask 998400   ;;  %v1735_v2 = vld [vmem:[%s4446_s7 + $0x308] sm:$0xff] }
 0x38d   :  { %v1508_v21 = vsel %vm1507_vm3, %v1506_v14, %v1505_v60  ;;  %v1258_v26 = vsel %vm1257_vm7, %v1256_v20, %v3900_v57  ;;  %vm1300_vm3 = vcmask 614672   ;;  %vm1537_vm7 = vcmask 572416   ;;  %v1752_v60 = vld [vmem:[%s4446_s7 + $0x390] sm:$0xff]  ;;  %v1706_v20 = vld [vmem:[%s4446_s7 + $0x220] sm:$0xff] }
 0x38e   :  { %v3904_v62 = vpop.permute.xlu1 %1530  ;;  %v1223_v63 = vpop.permute.xlu0 %1222  ;;  %v1538_v39 = vsel %vm1537_vm7, %v1536_v31, %v3886_v46  ;;  %v1757_v31 = vld [vmem:[%s4446_s7 + $0x3b8] sm:$0xff]  ;;  %vm1410_vm7 = vcmask 1041280  }
 0x38f   :  { %v1224_v8 = vrot.slane %v1223_v63, 6 }
 0x391   :  { %v1226_v15 = vsel %vm1225_vm15, %v1224_v8, %v1223_v63  ;;  %vm1522_vm15 = vcmask 588800   ;;  %v1723_v8 = vld [vmem:[%s4446_s7 + $0x2a8] sm:$0xff] }
 0x392   :  { %v3906_v1 = vpop.permute.xlu1 %1541  ;;  %v3908_v3 = vpop.permute.xlu0 %1272  ;;  %v1523_v33 = vsel %vm1522_vm15, %v1521_v25, %v3896_v54  ;;  %vm1567_vm15 = vcmask 539648   ;;  %v1738_v25 = vld [vmem:[%s4446_s7 + $0x320] sm:$0xff] }
 0x396   :  { %v1192_v4 = vpop.permute.xlu1 %1191  ;;  %v3910_v5 = vpop.permute.xlu0 %1297 }
 0x397   :  { %v1193_v7 = vrot.slane %v1192_v4, 6 }
 0x399   :  { %v1195_v9 = vsel %vm1194_vm10, %v1193_v7, %v1192_v4  ;;  %vm1291_vm10 = vcmask 1041344   ;;  %v1705_v4 = vld [vmem:[%s4446_s7 + $0x218] sm:$0xff]  ;;  %v1722_v7 = vld [vmem:[%s4446_s7 + $0x2a0] sm:$0xff] }
 0x39a   :  { %1200 = vst.msk [vmem:[#allocation2] sm:$0x5] %vm3912_vm11, %v1195_v9  ;;  %v1490_v10 = vpop.permute.xlu1 %1489  ;;  %v1217_v11 = vpop.permute.xlu0 %1216  ;;  %v3024_v9 = vpack.c.bf16 %v1753_v61, %v1752_v60  ;;  %v1743_v61 = vld [vmem:[%s4446_s7 + $0x348] sm:$0xff] }
 0x39b   :  { %v1491_v13 = vrot.slane %v1490_v10, 6  ;;  %1213 = vst.msk [vmem:[#allocation2 + $0x2] sm:$0x1] %vm1212_vm14, %v1210_v55 }
 0x39c   :  { %1220 = vst.msk [vmem:[#allocation2 + $0x2] sm:$0x1] %vm1219_vm0, %v1217_v11  ;;  %v1737_v11 = vld [vmem:[%s4446_s7 + $0x318] sm:$0xff] }
 0x39d   :  { %v1493_v16 = vsel %vm1492_vm1, %v1491_v13, %v1490_v10  ;;  %1231 = vst.msk [vmem:[#allocation2 + $0x2] sm:$0x5] %vm3918_vm2, %v1226_v15  ;;  %vm1316_vm1 = vcmask 1041328   ;;  %v1736_v10 = vld [vmem:[%s4446_s7 + $0x310] sm:$0xff]  ;;  %v1754_v15 = vld [vmem:[%s4446_s7 + $0x3a0] sm:$0xff] }
 0x39e   :  { %1495 = vst.msk [vmem:[#allocation2 + $0x1] sm:$0x5] %vm3912_vm11, %v1493_v16  ;;  %v1501_v17 = vpop.permute.xlu1 %1500  ;;  %v1311_v18 = vpop.permute.xlu0 %1310  ;;  %vm1292_vm11 = vcmask 272386   ;;  %v1755_v16 = vld [vmem:[%s4446_s7 + $0x3a8] sm:$0xff] }
 0x39f   :  { %1499 = vst.msk [vmem:[#allocation2 + $0x3] sm:$0x1] %vm1212_vm14, %v1497_v53  ;;  %vm1275_vm14 = vcmask 975472   ;;  %v1312_v28 = vrot.slane %v1311_v18, 6  ;;  %v1734_v53 = vld [vmem:[%s4446_s7 + $0x300] sm:$0xff]  ;;  %v3028_v24 = vpack.c.bf16 %v1755_v16, %v1754_v15  ;;  %v1745_v15 = vld [vmem:[%s4446_s7 + $0x358] sm:$0xff] }
 0x3a0   :  { %1503 = vst.msk [vmem:[#allocation2 + $0x3] sm:$0x1] %vm1219_vm0, %v1501_v17  ;;  %vm3945_vm0 = vmor %vm1292_vm11, %vm1291_vm10  ;;  %vm1348_vm11 = vcmask 239618   ;;  %v3022_v6 = vpack.c.bf16 %v1735_v2, %v1734_v53  ;;  %v1710_v53 = vld [vmem:[%s4446_s7 + $0x240] sm:$0xff]  ;;  %v1711_v2 = vld [vmem:[%s4446_s7 + $0x248] sm:$0xff] }
 0x3a1   :  { %1510 = vst.msk [vmem:[#allocation2 + $0x3] sm:$0x5] %vm3918_vm2, %v1508_v21  ;;  %vm1317_vm2 = vcmask 256002   ;;  %v1314_v35 = vsel %vm1313_vm4, %v1312_v28, %v1311_v18  ;;  %v2996_v18 = vpack.c.bf16 %v1723_v8, %v1722_v7  ;;  %v1707_v21 = vld [vmem:[%s4446_s7 + $0x228] sm:$0xff]  ;;  %vm1369_vm4 = vcmask 926272  }
 0x3a2   :  { %v1550_v22 = vpop.permute.xlu1 %1549  ;;  %v1235_v19 = vpop.permute.xlu0 %1234  ;;  %vm3965_vm10 = vmor %vm1317_vm2, %vm1316_vm1  ;;  %vm1380_vm1 = vcmask 223234   ;;  %vm1356_vm2 = vcmask 581872  }
 0x3a3   :  { %1238 = vst.msk [vmem:[#allocation2 + $0x4] sm:$0x1] %vm1237_vm6, %v1235_v19  ;;  %v1551_v36 = vrot.slane %v1550_v22, 6  ;;  %v1725_v19 = vld [vmem:[%s4446_s7 + $0x2b8] sm:$0xff] }
 0x3a4   :  { %1251 = vst.msk [vmem:[#allocation2 + $0x4] sm:$0x1] %vm1250_vm8, %v3883_v43 }
 0x3a5   :  { %1263 = vst.msk [vmem:[#allocation2 + $0x4] sm:$0x5] %vm3933_vm9, %v1258_v26  ;;  %v1739_v26 = vld [vmem:[%s4446_s7 + $0x328] sm:$0xff] }
 0x3a6   :  { %1269 = vst.msk [vmem:[#allocation2 + $0x6] sm:$0x1] %vm1268_vm12, %v3894_v51  ;;  %v1512_v29 = vpop.permute.xlu1 %1511  ;;  %v1342_v30 = vpop.permute.xlu0 %1341  ;;  %v1720_v51 = vld [vmem:[%s4446_s7 + $0x290] sm:$0xff] }
 0x3a7   :  { %1276 = vst.msk [vmem:[#allocation2 + $0x6] sm:$0x1] %vm1275_vm14, %v3908_v3  ;;  %v1343_v45 = vrot.slane %v1342_v30, 6  ;;  %v1704_v3 = vld [vmem:[%s4446_s7 + $0x210] sm:$0xff] }
 0x3a8   :  { %1514 = vst.msk [vmem:[#allocation2 + $0x5] sm:$0x1] %vm1237_vm6, %v1512_v29  ;;  %vm1331_vm6 = vcmask 598272   ;;  %v2994_v14 = vpack.c.bf16 %v1705_v4, %v1704_v3  ;;  %v2998_v29 = vpack.c.bf16 %v1707_v21, %v1706_v20  ;;  %v3006_v3 = vpack.c.bf16 %v1711_v2, %v1710_v53  ;;  %v1760_v4 = vld [vmem:[%s4446_s7 + $0x3d0] sm:$0xff]  ;;  %v1762_v20 = vld [vmem:[%s4446_s7 + $0x3e0] sm:$0xff]  ;;  %v1763_v21 = vld [vmem:[%s4446_s7 + $0x3e8] sm:$0xff] }
 0x3a9   :  { %1518 = vst.msk [vmem:[#allocation2 + $0x5] sm:$0x1] %vm1250_vm8, %v3881_v42  ;;  %vm1552_vm8 = vcmask 556032  }
 0x3aa   :  { %1294 = vst.msk [vmem:[#allocation2 + $0x6] sm:$0x5] %vm3945_vm0, %v1289_v32  ;;  %v3975_v37 = vpop.permute.xlu1 %1564  ;;  %v1329_v38 = vpop.permute.xlu0 %1328  ;;  %v1553_v40 = vsel %vm1552_vm8, %v1551_v36, %v1550_v22  ;;  %v3026_v22 = vpack.c.bf16 %v1737_v11, %v1736_v10  ;;  %v3000_v32 = vpack.c.bf16 %v1725_v19, %v1724_v23  ;;  %v3030_v36 = vpack.c.bf16 %v1739_v26, %v1738_v25  ;;  %v1713_v10 = vld [vmem:[%s4446_s7 + $0x258] sm:$0xff]  ;;  %v1714_v19 = vld [vmem:[%s4446_s7 + $0x260] sm:$0xff] }
 0x3ab   :  { %1525 = vst.msk [vmem:[#allocation2 + $0x5] sm:$0x5] %vm3933_vm9, %v1523_v33  ;;  %vm1347_vm9 = vcmask 1041312   ;;  %v1566_v63 = vrot.slane %v3975_v37, 6  ;;  %v1708_v33 = vld [vmem:[%s4446_s7 + $0x230] sm:$0xff]  ;;  %vm1387_vm8 = vcmask 565472  }
 0x3ac   :  { %1301 = vst.msk [vmem:[#allocation2 + $0x8] sm:$0x1] %vm1300_vm3, %v3910_v5  ;;  %v1733_v26 = vld [vmem:[%s4446_s7 + $0x2f8] sm:$0xff] }
 0x3ad   :  { %1529 = vst.msk [vmem:[#allocation2 + $0x7] sm:$0x1] %vm1268_vm12, %v3890_v49  ;;  %vm1344_vm12 = vcmask 949248   ;;  %v1568_v17 = vsel %vm1567_vm15, %v1566_v63, %v3975_v37  ;;  %v1726_v37 = vld [vmem:[%s4446_s7 + $0x2c0] sm:$0xff]  ;;  %vm1435_vm15 = vcmask 1041264  }
 0x3ae   :  { %1307 = vst.msk [vmem:[#allocation2 + $0x8] sm:$0x1] %vm1306_vm5, %v3902_v58  ;;  %v1557_v41 = vpop.permute.xlu1 %1556  ;;  %v3991_v42 = vpop.permute.xlu0 %1366  ;;  %v2990_v58 = vpack.c.bf16 %v1703_v48, %v1702_v47  ;;  %v3002_v47 = vpack.c.bf16 %v1709_v34, %v1708_v33  ;;  %v1764_v33 = vld [vmem:[%s4446_s7 + $0x3f0] sm:$0xff]  ;;  %v1765_v34 = vld [vmem:[%s4446_s7 + $0x3f8] sm:$0xff] }
 0x3af   :  { %1533 = vst.msk [vmem:[#allocation2 + $0x7] sm:$0x1] %vm1275_vm14, %v3904_v62  ;;  %vm4019_vm14 = vmor %vm1348_vm11, %vm1347_vm9  ;;  %v1345_v62 = vsel %vm1344_vm12, %v1343_v45, %v1342_v30  ;;  %v1756_v30 = vld [vmem:[%s4446_s7 + $0x3b0] sm:$0xff]  ;;  %vm1394_vm9 = vcmask 909872   ;;  %vm1582_vm11 = vcmask 523264  }
 0x3b0   :  { %1319 = vst.msk [vmem:[#allocation2 + $0x8] sm:$0x5] %vm3965_vm10, %v1314_v35 }
 0x3b1   :  { %1332 = vst.msk [vmem:[#allocation2 + $0xa] sm:$0x1] %vm1331_vm6, %v1329_v38  ;;  %v1727_v38 = vld [vmem:[%s4446_s7 + $0x2c8] sm:$0xff] }
 0x3b2   :  { %1540 = vst.msk [vmem:[#allocation2 + $0x7] sm:$0x5] %vm3945_vm0, %v1538_v39  ;;  %v3996_v43 = vpop.permute.xlu1 %1575  ;;  %v3998_v44 = vpop.permute.xlu0 %1404  ;;  %vm1379_vm0 = vcmask 1041296   ;;  %v3032_v39 = vpack.c.bf16 %v1757_v31, %v1756_v30 }
 0x3b3   :  { %1544 = vst.msk [vmem:[#allocation2 + $0x9] sm:$0x1] %vm1300_vm3, %v3906_v1  ;;  %v2992_v1 = vpack.c.bf16 %v1721_v52, %v1720_v51  ;;  %vm1376_vm3 = vcmask 932864   ;;  %v1406_v51 = vrot.slane %v3998_v44, 6  ;;  %v3004_v52 = vpack.c.bf16 %v1727_v38, %v1726_v37  ;;  %v1716_v37 = vld [vmem:[%s4446_s7 + $0x270] sm:$0xff]  ;;  %v1717_v38 = vld [vmem:[%s4446_s7 + $0x278] sm:$0xff] }
 0x3b4   :  { %1548 = vst.msk [vmem:[#allocation2 + $0x9] sm:$0x1] %vm1306_vm5, %v3898_v56  ;;  %vm4114_vm5 = vmor %vm1380_vm1, %vm1379_vm0  ;;  %vm1436_vm0 = vcmask 190466   ;;  %vm1432_vm1 = vcmask 900096  }
 0x3b5   :  { %1555 = vst.msk [vmem:[#allocation2 + $0x9] sm:$0x5] %vm3965_vm10, %v1553_v40  ;;  %v1740_v40 = vld [vmem:[%s4446_s7 + $0x330] sm:$0xff]  ;;  %vm1411_vm10 = vcmask 206850  }
 0x3b6   :  { %1559 = vst.msk [vmem:[#allocation2 + $0xb] sm:$0x1] %vm1331_vm6, %v1557_v41  ;;  %v4023_v55 = vpop.permute.xlu1 %1594  ;;  %v1336_v56 = vpop.permute.xlu0 %1335  ;;  %v1741_v41 = vld [vmem:[%s4446_s7 + $0x338] sm:$0xff]  ;;  %vm1407_vm6 = vcmask 916480   ;;  %vm4151_vm12 = vmor %vm1411_vm10, %vm1410_vm7  ;;  %vm1466_vm7 = vcmask 1041248   ;;  %vm1467_vm10 = vcmask 174082  }
 0x3b7   :  { %1339 = vst.msk [vmem:[#allocation2 + $0xa] sm:$0x1] %vm1338_vm13, %v1336_v56  ;;  %v1596_v7 = vrot.slane %v4023_v55, 6 }
 0x3b8   :  { %1350 = vst.msk [vmem:[#allocation2 + $0xa] sm:$0x5] %vm4019_vm14, %v1345_v62  ;;  %v1798_v62 = vld [vmem:[%s4446_s7 + $0x500] sm:$0xff] }
 0x3b9   :  { %v1635_v46 = vld [vmem:[#allocation2] sm:$0xff] }
 0x3ba   :  { %v1823_v49 = vrot.slane %v1635_v46, %v3585_v0  ;;  %v1816_v50 = vcombine.high %v1635_v46, %v1635_v46  ;;  %v1561_v12 = vpop.permute.xlu1 %1560  ;;  %v4055_v13 = vpop.permute.xlu0 %1384 }
 0x3bb   :  { %1563 = vst.msk [vmem:[#allocation2 + $0xb] sm:$0x1] %vm1338_vm13, %v1561_v12  ;;  %vm1597_vm13 = vcmask 506880   ;;  %v1730_v12 = vld [vmem:[%s4446_s7 + $0x2e0] sm:$0xff] }
 0x3bc   :  { %v1831_v57 = vcombine.high %v1823_v49, %v1823_v49  ;;  %v1830_v59 = vrot.slane %v1816_v50, %v3585_v0  ;;  %1570 = vst.msk [vmem:[#allocation2 + $0xb] sm:$0x5] %vm4019_vm14, %v1568_v17  ;;  %v1759_v50 = vld [vmem:[%s4446_s7 + $0x3c8] sm:$0xff]  ;;  %vm1419_vm14 = vcmask 549072  }
 0x3be   :  { %1942 = vmatprep.mubr.f32.mxu1 %v1831_v57  ;;  %v1832_v5 = vcombine.high %v1830_v59, %v1830_v59  ;;  %v4086_v27 = vpop.permute.xlu1 %1586  ;;  %v1374_v28 = vpop.permute.xlu0 %1373  ;;  %v3034_v57 = vpack.c.bf16 %v1741_v41, %v1740_v40  ;;  %v1782_v40 = vld [vmem:[%s4446_s7 + $0x480] sm:$0xff]  ;;  %v1783_v41 = vld [vmem:[%s4446_s7 + $0x488] sm:$0xff] }
 0x3bf   :  { %1943 = vmatmul.mubr.f32.vlgmr.msra.gmra.mrb[4].mxu1 %v1823_v49  ;;  %v1375_v35 = vrot.slane %v1374_v28, 6  ;;  %v1758_v49 = vld [vmem:[%s4446_s7 + $0x3c0] sm:$0xff] }
 0x3c0   :  { %2991 = vmatpush3.bf16.msra.mxu1 %v2990_v58  ;;  %2012 = vmatprep.mubr.f32.mxu0 %v1832_v5  ;;  %v1728_v58 = vld [vmem:[%s4446_s7 + $0x2d0] sm:$0xff]  ;;  %v3036_v60 = vpack.c.bf16 %v1759_v50, %v1758_v49  ;;  %v1761_v5 = vld [vmem:[%s4446_s7 + $0x3d8] sm:$0xff] }
 0x3c1   :  { %2013 = vmatmul.mubr.f32.vlgmr.msra.gmra.mrb[2].mxu0 %v1830_v59  ;;  %2993 = vmatprep.subr.bf16.mxu1 %v2992_v1  ;;  %v1377_v54 = vsel %vm1376_vm3, %v1375_v35, %v1374_v28  ;;  %v1729_v59 = vld [vmem:[%s4446_s7 + $0x2d8] sm:$0xff]  ;;  %v1746_v28 = vld [vmem:[%s4446_s7 + $0x360] sm:$0xff]  ;;  %vm4251_vm3 = vmor %vm1436_vm0, %vm1435_vm15  ;;  %vm2390_vm15 = vcmask 9216  }
 0x3c2   :  { %3023 = vmatpush3.bf16.msra.mxu0 %v3022_v6  ;;  %v1580_v45 = vpop.permute.xlu1 %1579  ;;  %v1354_v46 = vpop.permute.xlu0 %1353  ;;  %v1408_v6 = vsel %vm1407_vm6, %v1406_v51, %v3998_v44  ;;  %v3008_v8 = vpack.c.bf16 %v1729_v59, %v1728_v58  ;;  %v3018_v51 = vpack.c.bf16 %v1717_v38, %v1716_v37  ;;  %vm1463_vm6 = vcmask 883712   ;;  %v1790_v37 = vld [vmem:[%s4446_s7 + $0x4c0] sm:$0xff]  ;;  %v1791_v38 = vld [vmem:[%s4446_s7 + $0x4c8] sm:$0xff] }
 0x3c3   :  { %3025 = vmatprep.subr.bf16.mxu0 %v3024_v9  ;;  %1357 = vst.msk [vmem:[#allocation2 + $0xc] sm:$0x1] %vm1356_vm2, %v1354_v46  ;;  %v1581_v56 = vrot.slane %v1580_v45, 6  ;;  %v1712_v9 = vld [vmem:[%s4446_s7 + $0x250] sm:$0xff] }
 0x3c4   :  { %2995 = vmatpush3.bf16.msra.mxu1 %v2994_v14  ;;  %1370 = vst.msk [vmem:[#allocation2 + $0xc] sm:$0x1] %vm1369_vm4, %v3991_v42  ;;  %v1742_v42 = vld [vmem:[%s4446_s7 + $0x340] sm:$0xff]  ;;  %v3040_v14 = vpack.c.bf16 %v1761_v5, %v1760_v4  ;;  %v1748_v46 = vld [vmem:[%s4446_s7 + $0x370] sm:$0xff] }
 0x3c5   :  { %2997 = vmatprep.subr.bf16.mxu1 %v2996_v18  ;;  %1382 = vst.msk [vmem:[#allocation2 + $0xc] sm:$0x5] %vm4114_vm5, %v1377_v54  ;;  %v1583_v11 = vsel %vm1582_vm11, %v1581_v56, %v1580_v45  ;;  %v3038_v44 = vpack.c.bf16 %v1743_v61, %v1742_v42  ;;  %v3010_v18 = vpack.c.bf16 %v1713_v10, %v1712_v9  ;;  %v1766_v56 = vld [vmem:[%s4446_s7 + $0x400] sm:$0xff]  ;;  %v1784_v42 = vld [vmem:[%s4446_s7 + $0x490] sm:$0xff]  ;;  %v1785_v61 = vld [vmem:[%s4446_s7 + $0x498] sm:$0xff] }
 0x3c6   :  { %3027 = vmatpush3.bf16.msra.mxu0 %v3026_v22  ;;  %v1572_v63 = vpop.permute.xlu1 %1571  ;;  %1388 = vst.msk [vmem:[#allocation2 + $0xe] sm:$0x1] %vm1387_vm8, %v4055_v13  ;;  %v1392_v1 = vpop.permute.xlu0 %1391  ;;  %v1731_v13 = vld [vmem:[%s4446_s7 + $0x2e8] sm:$0xff]  ;;  %v1598_v22 = vsel %vm1597_vm13, %v1596_v7, %v4023_v55  ;;  %v1732_v55 = vld [vmem:[%s4446_s7 + $0x2f0] sm:$0xff]  ;;  %v3048_v45 = vpack.c.bf16 %v1765_v34, %v1764_v33  ;;  %v3052_v54 = vpack.c.bf16 %v1783_v41, %v1782_v40  ;;  %v1769_v10 = vld [vmem:[%s4446_s7 + $0x418] sm:$0xff]  ;;  %vm1627_vm13 = vcmask 474112  }
 0x3c7   :  { %3029 = vmatprep.subr.bf16.mxu0 %v3028_v24  ;;  %1574 = vst.msk [vmem:[#allocation2 + $0xd] sm:$0x1] %vm1356_vm2, %v1572_v63  ;;  %v3012_v23 = vpack.c.bf16 %v1731_v13, %v1730_v12  ;;  %v1715_v24 = vld [vmem:[%s4446_s7 + $0x268] sm:$0xff]  ;;  %vm1425_vm2 = vcmask 893472   ;;  %v1768_v9 = vld [vmem:[%s4446_s7 + $0x410] sm:$0xff]  ;;  %v1805_v41 = vld [vmem:[%s4446_s7 + $0x538] sm:$0xff] }
 0x3c8   :  { %2999 = vmatpush3.bf16.msra.mxu1 %v2998_v29  ;;  %1395 = vst.msk [vmem:[#allocation2 + $0xe] sm:$0x1] %vm1394_vm9, %v1392_v1  ;;  %v1747_v29 = vld [vmem:[%s4446_s7 + $0x368] sm:$0xff]  ;;  %v1804_v40 = vld [vmem:[%s4446_s7 + $0x530] sm:$0xff] }
 0x3c9   :  { %3001 = vmatprep.subr.bf16.mxu1 %v3000_v32  ;;  %1578 = vst.msk [vmem:[#allocation2 + $0xd] sm:$0x1] %vm1369_vm4, %v3996_v43  ;;  %v1744_v43 = vld [vmem:[%s4446_s7 + $0x350] sm:$0xff]  ;;  %v3014_v32 = vpack.c.bf16 %v1715_v24, %v1714_v19  ;;  %vm1612_vm4 = vcmask 490496   ;;  %v1799_v63 = vld [vmem:[%s4446_s7 + $0x508] sm:$0xff]  ;;  %v1789_v24 = vld [vmem:[%s4446_s7 + $0x4b8] sm:$0xff] }
 0x3ca   :  { %3031 = vmatpush3.bf16.msra.mxu0 %v3030_v36  ;;  %1413 = vst.msk [vmem:[#allocation2 + $0xe] sm:$0x5] %vm4151_vm12, %v1408_v6  ;;  %v1591_v16 = vpop.permute.xlu1 %1590  ;;  %v1430_v17 = vpop.permute.xlu0 %1429  ;;  %v3042_v25 = vpack.c.bf16 %v1745_v15, %v1744_v43  ;;  %v3016_v36 = vpack.c.bf16 %v1733_v26, %v1732_v55  ;;  %v1787_v12 = vld [vmem:[%s4446_s7 + $0x4a8] sm:$0xff]  ;;  %v3085_v13 = vpack.c.bf16 %v1799_v63, %v1798_v62  ;;  %v1800_v43 = vld [vmem:[%s4446_s7 + $0x510] sm:$0xff]  ;;  %v1801_v15 = vld [vmem:[%s4446_s7 + $0x518] sm:$0xff]  ;;  %v3319_v55 = vmov 0.0  }
 0x3cb   :  { %3033 = vmatprep.subr.bf16.mxu0 %v3032_v39  ;;  %1585 = vst.msk [vmem:[#allocation2 + $0xd] sm:$0x5] %vm4114_vm5, %v1583_v11  ;;  %v1431_v35 = vrot.slane %v1430_v17, 6  ;;  %v3046_v39 = vpack.c.bf16 %v1747_v29, %v1746_v28  ;;  %vm1450_vm5 = vcmask 532672   ;;  %v1788_v19 = vld [vmem:[%s4446_s7 + $0x4b0] sm:$0xff]  ;;  %v1803_v28 = vld [vmem:[%s4446_s7 + $0x528] sm:$0xff] }
 0x3cc   :  { %3003 = vmatpush3.bf16.msra.mxu1 %v3002_v47  ;;  %1589 = vst.msk [vmem:[#allocation2 + $0xf] sm:$0x1] %vm1387_vm8, %v4086_v27  ;;  %v3044_v27 = vpack.c.bf16 %v1763_v21, %v1762_v20  ;;  %v1749_v47 = vld [vmem:[%s4446_s7 + $0x378] sm:$0xff]  ;;  %vm1457_vm8 = vcmask 877072   ;;  %v3064_v34 = vpack.c.bf16 %v1789_v24, %v1788_v19  ;;  %v1778_v63 = vld [vmem:[%s4446_s7 + $0x460] sm:$0xff] }
 0x3cd   :  { %3005 = vmatprep.subr.bf16.mxu1 %v3004_v52  ;;  %1593 = vst.msk [vmem:[#allocation2 + $0xf] sm:$0x1] %vm1394_vm9, %v1591_v16  ;;  %v1433_v52 = vsel %vm1432_vm1, %v1431_v35, %v1430_v17  ;;  %v3050_v59 = vpack.c.bf16 %v1749_v47, %v1748_v46  ;;  %vm3318_vm9 = vmmov 0   ;;  %v1772_v35 = vld [vmem:[%s4446_s7 + $0x430] sm:$0xff] }
 0x3ce   :  { %3035 = vmatpush3.bf16.msra.mxu0 %v3034_v57  ;;  %1600 = vst.msk [vmem:[#allocation2 + $0xf] sm:$0x5] %vm4151_vm12, %v1598_v22  ;;  %v1610_v30 = vpop.permute.xlu1 %1609  ;;  %v1417_v31 = vpop.permute.xlu0 %1416  ;;  %v1767_v57 = vld [vmem:[%s4446_s7 + $0x408] sm:$0xff]  ;;  %v1770_v22 = vld [vmem:[%s4446_s7 + $0x420] sm:$0xff]  ;;  %vm4319_vm12 = vmor %vm1467_vm10, %vm1466_vm7 }
 0x3cf   :  { %3037 = vmatprep.subr.bf16.mxu0 %v3036_v60  ;;  %1420 = vst.msk [vmem:[#allocation2 + $0x10] sm:$0x1] %vm1419_vm14, %v1417_v31  ;;  %v1611_v53 = vrot.slane %v1610_v30, 6  ;;  %v3054_v5 = vpack.c.bf16 %v1767_v57, %v1766_v56 }
 0x3d0   :  { %3007 = vmatpush3.bf16.msra.mxu1 %v3006_v3 }
 0x3d1   :  { %3009 = vmatprep.subr.bf16.mxu1 %v3008_v8  ;;  %v1613_v7 = vsel %vm1612_vm4, %v1611_v53, %v1610_v30  ;;  %v3056_v8 = vpack.c.bf16 %v1785_v61, %v1784_v42  ;;  %v1793_v53 = vld [vmem:[%s4446_s7 + $0x4d8] sm:$0xff]  ;;  %v1795_v42 = vld [vmem:[%s4446_s7 + $0x4e8] sm:$0xff] }
 0x3d2   :  { %3039 = vmatpush3.bf16.msra.mxu0 %v3038_v44  ;;  %v1602_v49 = vpop.permute.xlu1 %1601  ;;  %v1423_v50 = vpop.permute.xlu0 %1422  ;;  %v1786_v44 = vld [vmem:[%s4446_s7 + $0x4a0] sm:$0xff] }
 0x3d3   :  { %3041 = vmatprep.subr.bf16.mxu0 %v3040_v14  ;;  %1604 = vst.msk [vmem:[#allocation2 + $0x11] sm:$0x1] %vm1419_vm14, %v1602_v49  ;;  %v3317_v14 = vmov 0.0|0.0   ;;  %v3060_v21 = vpack.c.bf16 %v1787_v12, %v1786_v44  ;;  %vm1475_vm14 = vcmask 516272   ;;  %v3068_v49 = vpack.c.bf16 %v1791_v38, %v1790_v37 }
 0x3d4   :  { %3011 = vmatpush3.bf16.msra.mxu1 %v3010_v18  ;;  %1426 = vst.msk [vmem:[#allocation2 + $0x10] sm:$0x1] %vm1425_vm2, %v1423_v50  ;;  %v3058_v18 = vpack.c.bf16 %v1769_v10, %v1768_v9  ;;  %v1774_v50 = vld [vmem:[%s4446_s7 + $0x440] sm:$0xff]  ;;  %v1780_v9 = vld [vmem:[%s4446_s7 + $0x470] sm:$0xff]  ;;  %v1781_v10 = vld [vmem:[%s4446_s7 + $0x478] sm:$0xff] }
 0x3d5   :  { %3013 = vmatprep.subr.bf16.mxu1 %v3012_v23  ;;  %v1636_v2 = vld [vmem:[#allocation2 + $0x8] sm:$0xff]  ;;  %1438 = vst.msk [vmem:[#allocation2 + $0x10] sm:$0x5] %vm4251_vm3, %v1433_v52  ;;  %v1792_v52 = vld [vmem:[%s4446_s7 + $0x4d0] sm:$0xff] }
 0x3d6   :  { %3043 = vmatpush3.bf16.msra.mxu0 %v3042_v25  ;;  %v1840_v58 = vrot.slane %v1636_v2, %v3585_v0  ;;  %v1833_v60 = vcombine.high %v1636_v2, %v1636_v2  ;;  %v1606_v1 = vpop.permute.xlu1 %1605  ;;  %v1461_v3 = vpop.permute.xlu0 %1460  ;;  %v1771_v23 = vld [vmem:[%s4446_s7 + $0x428] sm:$0xff]  ;;  %v3088_v25 = vpack.c.bf16 %v1801_v15, %v1800_v43  ;;  %v3094_v2 = vpack.c.bf16 %v1805_v41, %v1804_v40  ;;  %v2299_v43 = vld [vmem:[%s4448_s9] sm:$0xff] }
 0x3d7   :  { %3045 = vmatprep.subr.bf16.mxu0 %v3044_v27  ;;  %1608 = vst.msk [vmem:[#allocation2 + $0x11] sm:$0x1] %vm1425_vm2, %v1606_v1  ;;  %v1462_v20 = vrot.slane %v1461_v3, 6  ;;  %v1802_v27 = vld [vmem:[%s4446_s7 + $0x520] sm:$0xff]  ;;  %v3062_v31 = vpack.c.bf16 %v1771_v23, %v1770_v22  ;;  %v3072_v57 = vpack.c.bf16 %v1793_v53, %v1792_v52  ;;  %v1779_v1 = vld [vmem:[%s4446_s7 + $0x468] sm:$0xff] }
 0x3d8   :  { %3015 = vmatpush3.bf16.msra.mxu1 %v3014_v32  ;;  %v1848_v4 = vcombine.high %v1840_v58, %v1840_v58  ;;  %v1847_v6 = vrot.slane %v1833_v60, %v3585_v0  ;;  %1615 = vst.msk [vmem:[#allocation2 + $0x11] sm:$0x5] %vm4251_vm3, %v1613_v7  ;;  %v1794_v60 = vld [vmem:[%s4446_s7 + $0x4e0] sm:$0xff] }
 0x3d9   :  { %3017 = vmatprep.subr.bf16.mxu1 %v3016_v36  ;;  %v1464_v32 = vsel %vm1463_vm6, %v1462_v20, %v1461_v3  ;;  %v1773_v36 = vld [vmem:[%s4446_s7 + $0x438] sm:$0xff]  ;;  %v3076_v62 = vpack.c.bf16 %v1795_v42, %v1794_v60  ;;  %v1796_v3 = vld [vmem:[%s4446_s7 + $0x4f0] sm:$0xff] }
 0x3da   :  { %3047 = vmatpush3.bf16.msra.mxu0 %v3046_v39  ;;  %2082 = vmatprep.mubr.f32.mxu1 %v1848_v4  ;;  %v1849_v11 = vcombine.high %v1847_v6, %v1847_v6  ;;  %v1625_v16 = vpop.permute.xlu1 %1624  ;;  %v1448_v17 = vpop.permute.xlu0 %1447  ;;  %v3091_v39 = vpack.c.bf16 %v1803_v28, %v1802_v27  ;;  %v3066_v47 = vpack.c.bf16 %v1773_v36, %v1772_v35  ;;  %v1797_v4 = vld [vmem:[%s4446_s7 + $0x4f8] sm:$0xff] }
 0x3db   :  { %3049 = vmatprep.subr.bf16.mxu0 %v3048_v45  ;;  %1451 = vst.msk [vmem:[#allocation2 + $0x12] sm:$0x1] %vm1450_vm5, %v1448_v17  ;;  %v1626_v33 = vrot.slane %v1625_v16, 6  ;;  %v2302_v17 = vld [vmem:[%s4448_s9 + $0x18] sm:$0xff] }
 0x3dc   :  { %3019 = vmatpush3.bf16.msra.mxu1 %v3018_v51  ;;  %2152 = vmatprep.mubr.f32.mxu0 %v1849_v11  ;;  %v1775_v51 = vld [vmem:[%s4446_s7 + $0x448] sm:$0xff]  ;;  %v3080_v11 = vpack.c.bf16 %v1797_v4, %v1796_v3 }
 0x3dd   :  { %3053 = vmatprep.subr.bf16.mxu1 %v3052_v54  ;;  %v1628_v48 = vsel %vm1627_vm13, %v1626_v33, %v1625_v16  ;;  %v3070_v56 = vpack.c.bf16 %v1775_v51, %v1774_v50  ;;  %v2301_v16 = vld [vmem:[%s4448_s9 + $0x10] sm:$0xff] }
 0x3de   :  { %3051 = vmatpush3.bf16.msra.mxu0 %v3050_v59  ;;  %v1617_v29 = vpop.permute.xlu1 %1616  ;;  %v1455_v30 = vpop.permute.xlu0 %1454  ;;  %v1777_v59 = vld [vmem:[%s4446_s7 + $0x458] sm:$0xff] }
 0x3df   :  { %2083 = vmatmul.mubr.f32.vlgmr.msra.gmra.mrb[6].mxu1 %v1840_v58  ;;  %3084 = vmatprep.subr.bf16.mxu0 %v3317_v14  ;;  %1619 = vst.msk [vmem:[#allocation2 + $0x13] sm:$0x1] %vm1450_vm5, %v1617_v29  ;;  %v1776_v58 = vld [vmem:[%s4446_s7 + $0x450] sm:$0xff] }
 0x3e0   :  { %3055 = vmatpush3.bf16.msra.mxu1 %v3054_v5  ;;  %1458 = vst.msk [vmem:[#allocation2 + $0x12] sm:$0x1] %vm1457_vm8, %v1455_v30  ;;  %v3074_v61 = vpack.c.bf16 %v1777_v59, %v1776_v58  ;;  %v3078_v5 = vpack.c.bf16 %v1779_v1, %v1778_v63 }
 0x3e1   :  { %2153 = vmatmul.mubr.f32.vlgmr.msra.gmra.mrb[4].mxu0 %v1847_v6  ;;  %3057 = vmatprep.subr.bf16.mxu1 %v3056_v8  ;;  %1469 = vst.msk [vmem:[#allocation2 + $0x12] sm:$0x5] %vm4319_vm12, %v1464_v32 }
 0x3e2   :  { %3086 = vmatpush3.bf16.msra.mxu0 %v3085_v13  ;;  %2840 = vmatprep.mubr.msk.f32.mxu0 %vm3318_vm9, %v3319_v55  ;;  %v1621_v45 = vpop.permute.xlu1 %1620  ;;  %v1473_v46 = vpop.permute.xlu0 %1472  ;;  %v3082_v13 = vpack.c.bf16 %v1781_v10, %v1780_v9 }
 0x3e3   :  { %3087 = vmatprep.subr.bf16.mxu0 %v3317_v14  ;;  %1623 = vst.msk [vmem:[#allocation2 + $0x13] sm:$0x1] %vm1457_vm8, %v1621_v45  ;;  %v2467_v45 = vld [vmem:[%s4449_s10] ss:$0 sm:$0xff] }
 0x3e4   :  { %3059 = vmatpush3.bf16.msra.mxu1 %v3058_v18  ;;  %1476 = vst.msk [vmem:[#allocation2 + $0x14] sm:$0x1] %vm1475_vm14, %v1473_v46  ;;  %v3100_v18 = vpack.c.bf16 %v2302_v17, %v2301_v16 }
 0x3e5   :  { %3061 = vmatprep.subr.bf16.mxu1 %v3060_v21  ;;  %1630 = vst.msk [vmem:[#allocation2 + $0x13] sm:$0x5] %vm4319_vm12, %v1628_v48  ;;  %v2465_v21 = vld [vmem:[%s4447_s8] ss:$0 sm:$0xff] }
 0x3e6   :  { %3089 = vmatpush3.bf16.msra.mxu0 %v3088_v25  ;;  %v1632_v54 = vpop.permute.xlu1 %1631 }
 0x3e7   :  { %3090 = vmatprep.subr.bf16.mxu0 %v3317_v14  ;;  %1634 = vst.msk [vmem:[#allocation2 + $0x15] sm:$0x1] %vm1475_vm14, %v1632_v54 }
 0x3e8   :  { %3063 = vmatpush3.bf16.msra.mxu1 %v3062_v31 }
 0x3e9   :  { %3065 = vmatprep.subr.bf16.mxu1 %v3064_v34 }
 0x3ea   :  { %3092 = vmatpush3.bf16.msra.mxu0 %v3091_v39 }
 0x3eb   :  { %3093 = vmatprep.subr.bf16.mxu0 %v3317_v14 }
 0x3ec   :  { %3067 = vmatpush3.bf16.msra.mxu1 %v3066_v47 }
 0x3ed   :  { %3069 = vmatprep.subr.bf16.mxu1 %v3068_v49 }
 0x3ee   :  { %3095 = vmatpush3.bf16.msra.mxu0 %v3094_v2  ;;  %v1637_v6 = vld [vmem:[#allocation2 + $0x10] sm:$0x3f] }
 0x3ef   :  { %3096 = vmatprep.subr.bf16.mxu0 %v3317_v14  ;;  %v1850_v7 = vcombine.high %v1637_v6, %v1637_v6  ;;  %v1857_v8 = vrot.slane %v1637_v6, %v3585_v0 }
 0x3f0   :  { %3071 = vmatpush3.bf16.msra.mxu1 %v3070_v56 }
 0x3f1   :  { %3073 = vmatprep.subr.bf16.mxu1 %v3072_v57  ;;  %v1864_v44 = vrot.slane %v1850_v7, %v3585_v0  ;;  %v1865_v12 = vcombine.high %v1857_v8, %v1857_v8  ;;  %v2300_v0 = vld [vmem:[%s4448_s9 + $0x8] sm:$0xff] }
 0x3f2   :  { %v3097_v15 = vpack.c.bf16 %v2300_v0, %v2299_v43 }
 0x3f3   :  { %2222 = vmatprep.mubr.f32.mxu1 %v1865_v12  ;;  %2841 = vmatmul.mubr.msk.f32.vlgmr.msra.gmra.mrb[6].mxu0 %vm1582_vm11, %v1864_v44  ;;  %vm2310_vm11 = vcmask 261120  }
 0x3f4   :  { %3075 = vmatpush3.bf16.msra.mxu1 %v3074_v61  ;;  %2851 = vmatprep.mubr.msk.f32.mxu0 %vm3318_vm9, %v3319_v55 }
 0x3f5   :  { %3077 = vmatprep.subr.bf16.mxu1 %v3076_v62  ;;  %3098 = vmatpush3.bf16.msra.mxu0 %v3097_v15 }
 0x3f6   :  { %3099 = vmatprep.subr.bf16.mxu0 %v3317_v14 }
 0x3f8   :  { %3079 = vmatpush3.bf16.msra.mxu1 %v3078_v5 }
 0x3f9   :  { %3081 = vmatprep.subr.bf16.mxu1 %v3080_v11  ;;  %3101 = vmatpush3.bf16.msra.mxu0 %v3100_v18 }
 0x3fc   :  { %3083 = vmatpush3.bf16.msra.mxu1 %v3082_v13 }
 0x3ff   :  { %2223 = vmatmul.mubr.f32.vlgmr.msra.gmra.mrb[8].mxu1 %v1857_v8 }
 0x492   :  { %v2562_v20 = vpop.f32.mrb[4].mxu1 }
 0x493   :  { %v2563_v22 = vpop.f32.mrb[5].mxu1 }
 0x494   :  { %v2564_v23 = vadd.f32 %v2563_v22, %v2562_v20  ;;  %v2597_v19 = vpop.f32.mrb[2].mxu0 }
 0x495   :  { %v2598_v24 = vpop.f32.mrb[3].mxu0 }
 0x496   :  { %v1945_v14 = vadd.f32 %v2564_v23, %v2465_v21  ;;  %v2599_v25 = vadd.f32 %v2598_v24, %v2597_v19 }
 0x498   :  { %v2015_v55 = vadd.f32 %v2599_v25, %v1945_v14 }
 0x4b2   :  { %v2632_v26 = vpop.f32.mrb[6].mxu1 }
 0x4b3   :  { %v2633_v27 = vpop.f32.mrb[7].mxu1 }
 0x4b4   :  { %v2634_v28 = vadd.f32 %v2633_v27, %v2632_v26  ;;  %v2667_v29 = vpop.f32.mrb[4].mxu0 }
 0x4b5   :  { %v2668_v30 = vpop.f32.mrb[5].mxu0 }
 0x4b6   :  { %v2085_v31 = vadd.f32 %v2634_v28, %v2015_v55  ;;  %v2669_v32 = vadd.f32 %v2668_v30, %v2667_v29 }
 0x4b8   :  { %v2155_v33 = vadd.f32 %v2669_v32, %v2085_v31 }
 0x4c6   :  { %v2294_v34 = vpop.f32.mrb[6].mxu0 }
 0x4c7   :  { %v2842_v35 = vpop.f32.mrb[7].mxu0 }
 0x4d2   :  { %v2702_v36 = vpop.f32.mrb[8].mxu1 }
 0x4d3   :  { %v2703_v37 = vpop.f32.mrb[9].mxu1 }
 0x4d4   :  { %v2704_v38 = vadd.f32 %v2703_v37, %v2702_v36 }
 0x4d6   :  { %v2225_v39 = vadd.f32 %v2704_v38, %v2155_v33 }
 0x4d8   :  { %v2295_v40 = vadd.f32 %v2294_v34, %v2225_v39 }
 0x4da   :  { %v2298_v41 = vmax.f32 %v2295_v40, 0.0 }
 0x4dc   :  { %2852 = vmatmul.mubr.msk.f32.vlgmr.msra.gmra.mrb[8].mxu0 %vm2310_vm11, %v2298_v41 }
 0x5af   :  { %v2380_v46 = vpop.f32.mrb[8].mxu0 }
 0x5b0   :  { %v2381_v47 = vadd.f32 %v2467_v45, %v2380_v46  ;;  %v2853_v48 = vpop.f32.mrb[9].mxu0 }
 0x5b2   :  { %v2469_v49 = vmul.f32 -1.442695, %v2381_v47 }
 0x5b4   :  { %3242 = vpow2.f32 %v2469_v49 }
 0x5be   :  { %v3243_v50 = vpop.eup %3242 }
 0x5bf   :  { %v2387_v51 = vadd.f32 1.0, %v3243_v50 }
 0x5c1   :  { %3244 = vrcp.f32 %v2387_v51 }
 0x5cb   :  { %v3245_v52 = vpop.eup %3244 }
 0x5cc   :  { %2391 = vst.msk [vmem:[#allocation3] sm:$0x3] %vm2390_vm15, %v3245_v52 }
 0x5cd   :  { %3257 = shalt.err (!%p3254_p4)
}
 0x5ce   :  { %s3258_s0 = scalar_lea.hbm %s4450_s11, 32 }
 0x5cf   :  { %p3259_p5 = scmp.ne.s32.totalorder %s4450_s11, %s3258_s0  ;;  %p3262_p6 = scmp.lt.u32.totalorder %s3258_s0, %s4450_s11 }
 0x5d1   :  { %p3264_p7 = pnand %p3262_p6, %p3259_p5 }
 0x5d3   :  { %3267 = shalt.err (!%p3264_p7)
}
 0x5d4   :  { %2401 = dma.vmem_to_hbm [thread:$0]  %s2399_s23, 32, %s4450_s11, [#allocation4]  }
 0x5d5   :  { %3268 = dma.done.wait [#allocation4], 32  }
 0x5d6   :  { %3269 = vsyncadd [#allocation4], 4294967264 }
 0x5d7   :  { %2405 = vsyncpa [#allocation4], 1 }

</bundles_post_ra>
